<compile_context>
chip_gen: v7x
topology: tpu7x:2x2x1
jax: 0.10.0
libtpu: 0.0.40
codegen_flags: <defaults>
</compile_context>

<pallas_src>
import math
import jax
import jax.numpy as jnp
from jax.experimental import pallas as pl
from jax.experimental.pallas import tpu as pltpu

# ----- model hyper-parameters (small, consistent with the module) -----
B, S, INPUT_SIZE = 2, 8, 16
D_MODEL, NHEAD, NUM_LAYERS, DIM_FF = 32, 4, 2, 64
HEAD_DIM = D_MODEL // NHEAD
LN_EPS = 1e-5

BS = B * S                      # rows of the flattened (batch*seq, feature) slab
HBS = NHEAD * BS                # rows of the "all heads stacked" slab
SCALE = 1.0 / math.sqrt(HEAD_DIM)
SQRT_D = math.sqrt(D_MODEL)
NEG_INF = -1e30


def _layer_norm(x, w, b):
    mu = jnp.mean(x, axis=-1, keepdims=True)
    var = jnp.mean((x - mu) ** 2, axis=-1, keepdims=True)
    return (x - mu) * jax.lax.rsqrt(var + LN_EPS) * w + b


def transformer_encoder_kernel(src_ref, pe_ref, pool_ref, hmask_ref, bmask_ref,
                               wp_ref, bp_ref,
                               win_ref, bin_ref, wout_ref, bout_ref,
                               ln1w_ref, ln1b_ref, w1_ref, b1_ref,
                               w2_ref, b2_ref, ln2w_ref, ln2b_ref,
                               out_ref):
    # Whole batch in one grid step; activations stay a 2-D (B*S, feature) slab so
    # every op is a plain rank-2 matmul / VPU elementwise op (no reshapes, no .T).
    x = jnp.dot(src_ref[...], wp_ref[...],
                preferred_element_type=jnp.float32) + bp_ref[...]
    x = x * SQRT_D + pe_ref[...]
    # TODO(synk): dropout layers are treated as eval-mode identity (no RNG).

    hmask = hmask_ref[...]     # (NHEAD*B*S, D)   block-diagonal head-column mask
    bmask = bmask_ref[...]     # (NHEAD*B*S, B*S) additive cross-batch mask (0 / -1e30)

    for l in range(NUM_LAYERS):
        # ---------- self-attention: all batches & heads in two matmuls ----------
        qkv = jnp.dot(x, win_ref[l],
                      preferred_element_type=jnp.float32) + bin_ref[l]
        q = qkv[:, :D_MODEL]
        k = qkv[:, D_MODEL:2 * D_MODEL]
        v = qkv[:, 2 * D_MODEL:]

        # Replicate q once per head; zero out the other heads' feature columns.
        # Row (h*B*S + r) of q_bd holds only head-h features of token r, so the
        # full-D contraction against k reproduces the per-head Q_h @ K_h^T scores.
        q_bd = jnp.concatenate([q] * NHEAD, axis=0) * hmask              # (H*B*S, D)
        s = jnp.einsum('qd,kd->qk', q_bd, k,
                       preferred_element_type=jnp.float32)               # (H*B*S, B*S)
        s = s * SCALE + bmask                    # forbid attention across the batch
        s = s - jnp.max(s, axis=-1, keepdims=True)
        p = jnp.exp(s)
        p = p / jnp.sum(p, axis=-1, keepdims=True)
        o = jnp.dot(p, v, preferred_element_type=jnp.float32) * hmask    # (H*B*S, D)
        # Fold the per-head replicas back together (each keeps only its own columns).
        attn = o[0:BS]
        for h in range(1, NHEAD):
            attn = attn + o[h * BS:(h + 1) * BS]                         # (B*S, D)
        attn = jnp.dot(attn, wout_ref[l],
                       preferred_element_type=jnp.float32) + bout_ref[l]
        x = _layer_norm(x + attn, ln1w_ref[l], ln1b_ref[l])

        # ---------- feed-forward ----------
        h1 = jnp.maximum(
            jnp.dot(x, w1_ref[l], preferred_element_type=jnp.float32) + b1_ref[l],
            0.0)
        ff = jnp.dot(h1, w2_ref[l], preferred_element_type=jnp.float32) + b2_ref[l]
        x = _layer_norm(x + ff, ln2w_ref[l], ln2b_ref[l])

    # mean pooling over the sequence: one (B, B*S) x (B*S, D) matmul
    out_ref[...] = jnp.dot(pool_ref[...], x, preferred_element_type=jnp.float32)


def transformer_encoder(src, params):
    # ----- host-side prep: pre-transposed weights, 2-D biases, tiled PE, masks -----
    src2d = src.reshape(BS, INPUT_SIZE)                                   # one contiguous block
    pe_t = jnp.tile(params["pe"], (B, 1))                                 # (B*S, D)
    wp_t = params["wp"].T                                                 # (in, D)
    bp = params["bp"].reshape(1, D_MODEL)
    win_t = jnp.transpose(params["win"], (0, 2, 1))                       # (L, D, 3D)
    bin_ = params["bin"].reshape(NUM_LAYERS, 1, 3 * D_MODEL)
    wout_t = jnp.transpose(params["wout"], (0, 2, 1))                     # (L, D, D)
    bout = params["bout"].reshape(NUM_LAYERS, 1, D_MODEL)
    w1_t = jnp.transpose(params["w1"], (0, 2, 1))                         # (L, D, FF)
    b1 = params["b1"].reshape(NUM_LAYERS, 1, DIM_FF)
    w2_t = jnp.transpose(params["w2"], (0, 2, 1))                         # (L, FF, D)
    b2 = params["b2"].reshape(NUM_LAYERS, 1, D_MODEL)
    ln1w = params["ln1w"].reshape(NUM_LAYERS, 1, D_MODEL)
    ln1b = params["ln1b"].reshape(NUM_LAYERS, 1, D_MODEL)
    ln2w = params["ln2w"].reshape(NUM_LAYERS, 1, D_MODEL)
    ln2b = params["ln2b"].reshape(NUM_LAYERS, 1, D_MODEL)

    # block-diagonal head mask: row h*B*S + r keeps only head-h feature columns
    head_of_col = jnp.arange(D_MODEL) // HEAD_DIM                         # (D,)
    head_of_row = jnp.repeat(jnp.arange(NHEAD), BS)                       # (H*B*S,)
    hmask = (head_of_row[:, None] == head_of_col[None, :]).astype(jnp.float32)

    # additive mask forbidding attention across batch elements
    batch_of_qrow = jnp.tile(jnp.repeat(jnp.arange(B), S), (NHEAD,))      # (H*B*S,)
    batch_of_kcol = jnp.repeat(jnp.arange(B), S)                          # (B*S,)
    bmask = jnp.where(batch_of_qrow[:, None] == batch_of_kcol[None, :],
                      0.0, NEG_INF).astype(jnp.float32)                   # (H*B*S, B*S)

    # mean-pooling matrix: out[b] = (1/S) * sum_i x[b*S + i]
    pool = (jnp.arange(B)[:, None] == batch_of_kcol[None, :]
            ).astype(jnp.float32) / S                                     # (B, B*S)

    inputs = [src2d, pe_t, pool, hmask, bmask, wp_t, bp, win_t, bin_, wout_t,
              bout, ln1w, ln1b, w1_t, b1, w2_t, b2, ln2w, ln2b]

    def full_spec(a):
        return pl.BlockSpec(a.shape, lambda *_, _n=a.ndim: (0,) * _n)

    out = pl.pallas_call(
        transformer_encoder_kernel,
        out_shape=jax.ShapeDtypeStruct((B, D_MODEL), jnp.float32),
        grid=(1,),
        in_specs=[full_spec(a) for a in inputs],
        out_specs=pl.BlockSpec((B, D_MODEL), lambda *_: (0, 0)),
        compiler_params=pltpu.CompilerParams(dimension_semantics=("arbitrary",)),
    )(*inputs)
    return out


# ----------------- deterministic parameter construction -----------------
def make_params(key):
    ks = jax.random.split(key, 9)
    U = lambda k, shape, a: jax.random.uniform(k, shape, jnp.float32, -a, a)

    # input_projection: uniform(-0.1, 0.1) weight, zero bias (as init_weights)
    wp = U(ks[0], (D_MODEL, INPUT_SIZE), 0.1)
    bp = jnp.zeros((1, D_MODEL), jnp.float32)

    inv_d = 1.0 / math.sqrt(D_MODEL)
    win = U(ks[1], (NUM_LAYERS, 3 * D_MODEL, D_MODEL), inv_d)
    binb = U(ks[2], (NUM_LAYERS, 3 * D_MODEL), 0.02)
    wout = U(ks[3], (NUM_LAYERS, D_MODEL, D_MODEL), inv_d)
    bout = U(ks[4], (NUM_LAYERS, D_MODEL), 0.02)
    w1 = U(ks[5], (NUM_LAYERS, DIM_FF, D_MODEL), inv_d)
    b1 = U(ks[6], (NUM_LAYERS, DIM_FF), 0.02)
    w2 = U(ks[7], (NUM_LAYERS, D_MODEL, DIM_FF), 1.0 / math.sqrt(DIM_FF))
    b2 = U(ks[8], (NUM_LAYERS, D_MODEL), 0.02)

    # LayerNorm default init (ones / zeros)
    ln1w = jnp.ones((NUM_LAYERS, D_MODEL), jnp.float32)
    ln1b = jnp.zeros((NUM_LAYERS, D_MODEL), jnp.float32)
    ln2w = jnp.ones((NUM_LAYERS, D_MODEL), jnp.float32)
    ln2b = jnp.zeros((NUM_LAYERS, D_MODEL), jnp.float32)

    # positional encoding buffer (sliced to S positions), as in PositionalEncoding
    position = jnp.arange(S, dtype=jnp.float32)[:, None]
    div_term = jnp.exp(jnp.arange(0, D_MODEL, 2, dtype=jnp.float32)
                       * (-math.log(10000.0) / D_MODEL))
    pe = jnp.zeros((S, D_MODEL), jnp.float32)
    pe = pe.at[:, 0::2].set(jnp.sin(position * div_term))
    pe = pe.at[:, 1::2].set(jnp.cos(position * div_term))

    return dict(wp=wp, bp=bp, win=win, bin=binb, wout=wout, bout=bout,
                ln1w=ln1w, ln1b=ln1b, w1=w1, b1=b1, w2=w2, b2=b2,
                ln2w=ln2w, ln2b=ln2b, pe=pe)


# ----------------- pure-JAX reference (same math as the PyTorch module) -----------------
def reference(src, p):
    x = src @ p["wp"].T + p["bp"][0]
    x = x * SQRT_D + p["pe"][None]
    for l in range(NUM_LAYERS):
        qkv = x @ p["win"][l].T + p["bin"][l]
        q, k, v = qkv[..., :D_MODEL], qkv[..., D_MODEL:2 * D_MODEL], qkv[..., 2 * D_MODEL:]
        heads = []
        for h in range(NHEAD):
            sl = slice(h * HEAD_DIM, (h + 1) * HEAD_DIM)
            s = jnp.einsum('bqd,bkd->bqk', q[..., sl], k[..., sl]) * SCALE
            pr = jax.nn.softmax(s, axis=-1)
            heads.append(jnp.einsum('bqk,bkd->bqd', pr, v[..., sl]))
        attn = jnp.concatenate(heads, axis=-1) @ p["wout"][l].T + p["bout"][l]
        x = _layer_norm(x + attn, p["ln1w"][l], p["ln1b"][l])
        h1 = jax.nn.relu(x @ p["w1"][l].T + p["b1"][l])
        ff = h1 @ p["w2"][l].T + p["b2"][l]
        x = _layer_norm(x + ff, p["ln2w"][l], p["ln2b"][l])
    return x.mean(axis=1)


if __name__ == "__main__":
    root = jax.random.PRNGKey(0)
    k_src, k_par = jax.random.split(root)
    src = jax.random.normal(k_src, (B, S, INPUT_SIZE), jnp.float32)
    params = make_params(k_par)

    out = transformer_encoder(src, params)
    out = jax.block_until_ready(out)

    ref = reference(src, params)
    assert out.shape == (B, D_MODEL)
    assert jnp.allclose(out, ref, rtol=1e-4, atol=1e-4)
    print("KERNEL_OK")
</pallas_src>

<mosaic_0001>
module attributes {stable_mosaic.version = 11 : i64} {
  func.func @transformer_encoder_kernel(%arg0: i32, %arg1: memref<16x16xf32, #tpu.memory_space<vmem>>, %arg2: memref<16x32xf32, #tpu.memory_space<vmem>>, %arg3: memref<2x16xf32, #tpu.memory_space<vmem>>, %arg4: memref<64x32xf32, #tpu.memory_space<vmem>>, %arg5: memref<64x16xf32, #tpu.memory_space<vmem>>, %arg6: memref<16x32xf32, #tpu.memory_space<vmem>>, %arg7: memref<1x32xf32, #tpu.memory_space<vmem>>, %arg8: memref<2x32x96xf32, #tpu.memory_space<vmem>>, %arg9: memref<2x1x96xf32, #tpu.memory_space<vmem>>, %arg10: memref<2x32x32xf32, #tpu.memory_space<vmem>>, %arg11: memref<2x1x32xf32, #tpu.memory_space<vmem>>, %arg12: memref<2x1x32xf32, #tpu.memory_space<vmem>>, %arg13: memref<2x1x32xf32, #tpu.memory_space<vmem>>, %arg14: memref<2x32x64xf32, #tpu.memory_space<vmem>>, %arg15: memref<2x1x64xf32, #tpu.memory_space<vmem>>, %arg16: memref<2x64x32xf32, #tpu.memory_space<vmem>>, %arg17: memref<2x1x32xf32, #tpu.memory_space<vmem>>, %arg18: memref<2x1x32xf32, #tpu.memory_space<vmem>>, %arg19: memref<2x1x32xf32, #tpu.memory_space<vmem>>, %arg20: memref<2x32xf32, #tpu.memory_space<vmem>>) attributes {dimension_semantics = [#tpu.dimension_semantics<arbitrary>], iteration_bounds = array<i64: 1>, scalar_prefetch = 0 : i64, scratch_operands = 0 : i64, tpu.core_type = #tpu.core_type<tc>, window_params = [{pipeline_mode = #tpu.pipeline_mode<synchronous>, transform_indices = @transform_0, window_bounds = array<i64: 16, 16>}, {pipeline_mode = #tpu.pipeline_mode<synchronous>, transform_indices = @transform_1, window_bounds = array<i64: 16, 32>}, {pipeline_mode = #tpu.pipeline_mode<synchronous>, transform_indices = @transform_2, window_bounds = array<i64: 2, 16>}, {pipeline_mode = #tpu.pipeline_mode<synchronous>, transform_indices = @transform_3, window_bounds = array<i64: 64, 32>}, {pipeline_mode = #tpu.pipeline_mode<synchronous>, transform_indices = @transform_4, window_bounds = array<i64: 64, 16>}, {pipeline_mode = #tpu.pipeline_mode<synchronous>, transform_indices = @transform_5, window_bounds = array<i64: 16, 32>}, {pipeline_mode = #tpu.pipeline_mode<synchronous>, transform_indices = @transform_6, window_bounds = array<i64: 1, 32>}, {pipeline_mode = #tpu.pipeline_mode<synchronous>, transform_indices = @transform_7, window_bounds = array<i64: 2, 32, 96>}, {pipeline_mode = #tpu.pipeline_mode<synchronous>, transform_indices = @transform_8, window_bounds = array<i64: 2, 1, 96>}, {pipeline_mode = #tpu.pipeline_mode<synchronous>, transform_indices = @transform_9, window_bounds = array<i64: 2, 32, 32>}, {pipeline_mode = #tpu.pipeline_mode<synchronous>, transform_indices = @transform_10, window_bounds = array<i64: 2, 1, 32>}, {pipeline_mode = #tpu.pipeline_mode<synchronous>, transform_indices = @transform_11, window_bounds = array<i64: 2, 1, 32>}, {pipeline_mode = #tpu.pipeline_mode<synchronous>, transform_indices = @transform_12, window_bounds = array<i64: 2, 1, 32>}, {pipeline_mode = #tpu.pipeline_mode<synchronous>, transform_indices = @transform_13, window_bounds = array<i64: 2, 32, 64>}, {pipeline_mode = #tpu.pipeline_mode<synchronous>, transform_indices = @transform_14, window_bounds = array<i64: 2, 1, 64>}, {pipeline_mode = #tpu.pipeline_mode<synchronous>, transform_indices = @transform_15, window_bounds = array<i64: 2, 64, 32>}, {pipeline_mode = #tpu.pipeline_mode<synchronous>, transform_indices = @transform_16, window_bounds = array<i64: 2, 1, 32>}, {pipeline_mode = #tpu.pipeline_mode<synchronous>, transform_indices = @transform_17, window_bounds = array<i64: 2, 1, 32>}, {pipeline_mode = #tpu.pipeline_mode<synchronous>, transform_indices = @transform_18, window_bounds = array<i64: 2, 1, 32>}, {pipeline_mode = #tpu.pipeline_mode<synchronous>, transform_indices = @transform_19, window_bounds = array<i64: 2, 32>}]} {
    %c0 = arith.constant 0 : index
    %c0_0 = arith.constant 0 : index
    %0 = vector.load %arg1[%c0, %c0_0] : memref<16x16xf32, #tpu.memory_space<vmem>>, vector<16x16xf32>
    %c0_1 = arith.constant 0 : index
    %c0_2 = arith.constant 0 : index
    %1 = vector.load %arg6[%c0_1, %c0_2] : memref<16x32xf32, #tpu.memory_space<vmem>>, vector<16x32xf32>
    %cst = arith.constant dense<0.000000e+00> : vector<16x32xf32>
    %2 = tpu.matmul %0, %1, %cst {dimension_numbers = #tpu.dot_dimension_numbers<[1], [0], [0], [1], [0, 0, 1, 1], [], []>} : vector<16x16xf32>, vector<16x32xf32>, vector<16x32xf32> -> vector<16x32xf32>
    %c0_3 = arith.constant 0 : index
    %c0_4 = arith.constant 0 : index
    %3 = vector.load %arg7[%c0_3, %c0_4] : memref<1x32xf32, #tpu.memory_space<vmem>>, vector<1x32xf32>
    %4 = vector.broadcast %3 : vector<1x32xf32> to vector<16x32xf32>
    %5 = arith.addf %2, %4 : vector<16x32xf32>
    %cst_5 = arith.constant 5.65685415 : f32
    %6 = vector.broadcast %cst_5 : f32 to vector<16x32xf32>
    %7 = arith.mulf %5, %6 : vector<16x32xf32>
    %c0_6 = arith.constant 0 : index
    %c0_7 = arith.constant 0 : index
    %8 = vector.load %arg2[%c0_6, %c0_7] : memref<16x32xf32, #tpu.memory_space<vmem>>, vector<16x32xf32>
    %9 = arith.addf %7, %8 : vector<16x32xf32>
    %c0_8 = arith.constant 0 : index
    %c0_9 = arith.constant 0 : index
    %10 = vector.load %arg4[%c0_8, %c0_9] : memref<64x32xf32, #tpu.memory_space<vmem>>, vector<64x32xf32>
    %c0_10 = arith.constant 0 : index
    %c0_11 = arith.constant 0 : index
    %11 = vector.load %arg5[%c0_10, %c0_11] : memref<64x16xf32, #tpu.memory_space<vmem>>, vector<64x16xf32>
    %c0_12 = arith.constant 0 : index
    %c0_13 = arith.constant 0 : index
    %c0_14 = arith.constant 0 : index
    %12 = vector.load %arg8[%c0_12, %c0_13, %c0_14] : memref<2x32x96xf32, #tpu.memory_space<vmem>>, vector<1x32x96xf32>
    %13 = vector.shape_cast %12 : vector<1x32x96xf32> to vector<32x96xf32>
    %cst_15 = arith.constant dense<0.000000e+00> : vector<16x96xf32>
    %14 = tpu.matmul %9, %13, %cst_15 {dimension_numbers = #tpu.dot_dimension_numbers<[1], [0], [0], [1], [0, 0, 1, 1], [], []>} : vector<16x32xf32>, vector<32x96xf32>, vector<16x96xf32> -> vector<16x96xf32>
    %c0_16 = arith.constant 0 : index
    %c0_17 = arith.constant 0 : index
    %c0_18 = arith.constant 0 : index
    %15 = vector.load %arg9[%c0_16, %c0_17, %c0_18] : memref<2x1x96xf32, #tpu.memory_space<vmem>>, vector<1x1x96xf32>
    %16 = vector.shape_cast %15 : vector<1x1x96xf32> to vector<1x96xf32>
    %17 = vector.broadcast %16 : vector<1x96xf32> to vector<16x96xf32>
    %18 = arith.addf %14, %17 : vector<16x96xf32>
    %19 = vector.extract_strided_slice %18 {offsets = [0, 0], sizes = [16, 32], strides = [1, 1]} : vector<16x96xf32> to vector<16x32xf32>
    %20 = vector.extract_strided_slice %18 {offsets = [0, 32], sizes = [16, 32], strides = [1, 1]} : vector<16x96xf32> to vector<16x32xf32>
    %21 = vector.extract_strided_slice %18 {offsets = [0, 64], sizes = [16, 32], strides = [1, 1]} : vector<16x96xf32> to vector<16x32xf32>
    %22 = tpu.concatenate %19, %19, %19, %19 in 0 : vector<16x32xf32>, vector<16x32xf32>, vector<16x32xf32>, vector<16x32xf32> -> vector<64x32xf32>
    %23 = arith.mulf %22, %10 : vector<64x32xf32>
    "tpu.trace_start"() <{level = 10 : i32, message = "qd,kd->qk"}> : () -> ()
    %cst_19 = arith.constant dense<0.000000e+00> : vector<64x16xf32>
    %24 = tpu.matmul %23, %20, %cst_19 {dimension_numbers = #tpu.dot_dimension_numbers<[1], [1], [0], [0], [0, 0, 1, 0], [], []>} : vector<64x32xf32>, vector<16x32xf32>, vector<64x16xf32> -> vector<64x16xf32>
    "tpu.trace_stop"() : () -> ()
    %cst_20 = arith.constant 0.353553385 : f32
    %25 = vector.broadcast %cst_20 : f32 to vector<64x16xf32>
    %26 = arith.mulf %24, %25 : vector<64x16xf32>
    %27 = arith.addf %26, %11 : vector<64x16xf32>
    %cst_21 = arith.constant dense<0xFF800000> : vector<64xf32>
    %28 = vector.multi_reduction <maximumf>, %27, %cst_21 [1] : vector<64x16xf32> to vector<64xf32>
    %29 = vector.shape_cast %28 : vector<64xf32> to vector<64x1xf32>
    %30 = vector.broadcast %29 : vector<64x1xf32> to vector<64x16xf32>
    %31 = arith.subf %27, %30 : vector<64x16xf32>
    %32 = math.exp %31 : vector<64x16xf32>
    %cst_22 = arith.constant dense<0.000000e+00> : vector<64xf32>
    %33 = vector.multi_reduction <add>, %32, %cst_22 [1] : vector<64x16xf32> to vector<64xf32>
    %34 = vector.shape_cast %33 : vector<64xf32> to vector<64x1xf32>
    %35 = vector.broadcast %34 : vector<64x1xf32> to vector<64x16xf32>
    %36 = arith.divf %32, %35 : vector<64x16xf32>
    %cst_23 = arith.constant dense<0.000000e+00> : vector<64x32xf32>
    %37 = tpu.matmul %36, %21, %cst_23 {dimension_numbers = #tpu.dot_dimension_numbers<[1], [0], [0], [1], [0, 0, 1, 1], [], []>} : vector<64x16xf32>, vector<16x32xf32>, vector<64x32xf32> -> vector<64x32xf32>
    %38 = arith.mulf %37, %10 : vector<64x32xf32>
    %39 = vector.extract_strided_slice %38 {offsets = [0, 0], sizes = [16, 32], strides = [1, 1]} : vector<64x32xf32> to vector<16x32xf32>
    %40 = vector.extract_strided_slice %38 {offsets = [16, 0], sizes = [16, 32], strides = [1, 1]} : vector<64x32xf32> to vector<16x32xf32>
    %41 = arith.addf %39, %40 : vector<16x32xf32>
    %42 = vector.extract_strided_slice %38 {offsets = [32, 0], sizes = [16, 32], strides = [1, 1]} : vector<64x32xf32> to vector<16x32xf32>
    %43 = arith.addf %41, %42 : vector<16x32xf32>
    %44 = vector.extract_strided_slice %38 {offsets = [48, 0], sizes = [16, 32], strides = [1, 1]} : vector<64x32xf32> to vector<16x32xf32>
    %45 = arith.addf %43, %44 : vector<16x32xf32>
    %c0_24 = arith.constant 0 : index
    %c0_25 = arith.constant 0 : index
    %c0_26 = arith.constant 0 : index
    %46 = vector.load %arg10[%c0_24, %c0_25, %c0_26] : memref<2x32x32xf32, #tpu.memory_space<vmem>>, vector<1x32x32xf32>
    %47 = vector.shape_cast %46 : vector<1x32x32xf32> to vector<32x32xf32>
    %cst_27 = arith.constant dense<0.000000e+00> : vector<16x32xf32>
    %48 = tpu.matmul %45, %47, %cst_27 {dimension_numbers = #tpu.dot_dimension_numbers<[1], [0], [0], [1], [0, 0, 1, 1], [], []>} : vector<16x32xf32>, vector<32x32xf32>, vector<16x32xf32> -> vector<16x32xf32>
    %c0_28 = arith.constant 0 : index
    %c0_29 = arith.constant 0 : index
    %c0_30 = arith.constant 0 : index
    %49 = vector.load %arg11[%c0_28, %c0_29, %c0_30] : memref<2x1x32xf32, #tpu.memory_space<vmem>>, vector<1x1x32xf32>
    %50 = vector.shape_cast %49 : vector<1x1x32xf32> to vector<1x32xf32>
    %51 = vector.broadcast %50 : vector<1x32xf32> to vector<16x32xf32>
    %52 = arith.addf %48, %51 : vector<16x32xf32>
    %53 = arith.addf %9, %52 : vector<16x32xf32>
    %c0_31 = arith.constant 0 : index
    %c0_32 = arith.constant 0 : index
    %c0_33 = arith.constant 0 : index
    %54 = vector.load %arg12[%c0_31, %c0_32, %c0_33] : memref<2x1x32xf32, #tpu.memory_space<vmem>>, vector<1x1x32xf32>
    %55 = vector.shape_cast %54 : vector<1x1x32xf32> to vector<1x32xf32>
    %c0_34 = arith.constant 0 : index
    %c0_35 = arith.constant 0 : index
    %c0_36 = arith.constant 0 : index
    %56 = vector.load %arg13[%c0_34, %c0_35, %c0_36] : memref<2x1x32xf32, #tpu.memory_space<vmem>>, vector<1x1x32xf32>
    %57 = vector.shape_cast %56 : vector<1x1x32xf32> to vector<1x32xf32>
    %cst_37 = arith.constant dense<0.000000e+00> : vector<16xf32>
    %58 = vector.multi_reduction <add>, %53, %cst_37 [1] : vector<16x32xf32> to vector<16xf32>
    %59 = vector.shape_cast %58 : vector<16xf32> to vector<16x1xf32>
    %cst_38 = arith.constant 3.200000e+01 : f32
    %60 = vector.broadcast %cst_38 : f32 to vector<16x1xf32>
    %61 = arith.divf %59, %60 : vector<16x1xf32>
    %62 = vector.broadcast %61 : vector<16x1xf32> to vector<16x32xf32>
    %63 = arith.subf %53, %62 : vector<16x32xf32>
    %64 = arith.mulf %63, %63 : vector<16x32xf32>
    %cst_39 = arith.constant dense<0.000000e+00> : vector<16xf32>
    %65 = vector.multi_reduction <add>, %64, %cst_39 [1] : vector<16x32xf32> to vector<16xf32>
    %66 = vector.shape_cast %65 : vector<16xf32> to vector<16x1xf32>
    %cst_40 = arith.constant 3.200000e+01 : f32
    %67 = vector.broadcast %cst_40 : f32 to vector<16x1xf32>
    %68 = arith.divf %66, %67 : vector<16x1xf32>
    %69 = vector.broadcast %61 : vector<16x1xf32> to vector<16x32xf32>
    %70 = arith.subf %53, %69 : vector<16x32xf32>
    %cst_41 = arith.constant 9.99999974E-6 : f32
    %71 = vector.broadcast %cst_41 : f32 to vector<16x1xf32>
    %72 = arith.addf %68, %71 : vector<16x1xf32>
    %73 = math.rsqrt %72 : vector<16x1xf32>
    %74 = vector.broadcast %73 : vector<16x1xf32> to vector<16x32xf32>
    %75 = arith.mulf %70, %74 : vector<16x32xf32>
    %76 = vector.broadcast %55 : vector<1x32xf32> to vector<16x32xf32>
    %77 = arith.mulf %75, %76 : vector<16x32xf32>
    %78 = vector.broadcast %57 : vector<1x32xf32> to vector<16x32xf32>
    %79 = arith.addf %77, %78 : vector<16x32xf32>
    %c0_42 = arith.constant 0 : index
    %c0_43 = arith.constant 0 : index
    %c0_44 = arith.constant 0 : index
    %80 = vector.load %arg14[%c0_42, %c0_43, %c0_44] : memref<2x32x64xf32, #tpu.memory_space<vmem>>, vector<1x32x64xf32>
    %81 = vector.shape_cast %80 : vector<1x32x64xf32> to vector<32x64xf32>
    %cst_45 = arith.constant dense<0.000000e+00> : vector<16x64xf32>
    %82 = tpu.matmul %79, %81, %cst_45 {dimension_numbers = #tpu.dot_dimension_numbers<[1], [0], [0], [1], [0, 0, 1, 1], [], []>} : vector<16x32xf32>, vector<32x64xf32>, vector<16x64xf32> -> vector<16x64xf32>
    %c0_46 = arith.constant 0 : index
    %c0_47 = arith.constant 0 : index
    %c0_48 = arith.constant 0 : index
    %83 = vector.load %arg15[%c0_46, %c0_47, %c0_48] : memref<2x1x64xf32, #tpu.memory_space<vmem>>, vector<1x1x64xf32>
    %84 = vector.shape_cast %83 : vector<1x1x64xf32> to vector<1x64xf32>
    %85 = vector.broadcast %84 : vector<1x64xf32> to vector<16x64xf32>
    %86 = arith.addf %82, %85 : vector<16x64xf32>
    %cst_49 = arith.constant 0.000000e+00 : f32
    %87 = vector.broadcast %cst_49 : f32 to vector<16x64xf32>
    %88 = arith.maximumf %86, %87 : vector<16x64xf32>
    %c0_50 = arith.constant 0 : index
    %c0_51 = arith.constant 0 : index
    %c0_52 = arith.constant 0 : index
    %89 = vector.load %arg16[%c0_50, %c0_51, %c0_52] : memref<2x64x32xf32, #tpu.memory_space<vmem>>, vector<1x64x32xf32>
    %90 = vector.shape_cast %89 : vector<1x64x32xf32> to vector<64x32xf32>
    %cst_53 = arith.constant dense<0.000000e+00> : vector<16x32xf32>
    %91 = tpu.matmul %88, %90, %cst_53 {dimension_numbers = #tpu.dot_dimension_numbers<[1], [0], [0], [1], [0, 0, 1, 1], [], []>} : vector<16x64xf32>, vector<64x32xf32>, vector<16x32xf32> -> vector<16x32xf32>
    %c0_54 = arith.constant 0 : index
    %c0_55 = arith.constant 0 : index
    %c0_56 = arith.constant 0 : index
    %92 = vector.load %arg17[%c0_54, %c0_55, %c0_56] : memref<2x1x32xf32, #tpu.memory_space<vmem>>, vector<1x1x32xf32>
    %93 = vector.shape_cast %92 : vector<1x1x32xf32> to vector<1x32xf32>
    %94 = vector.broadcast %93 : vector<1x32xf32> to vector<16x32xf32>
    %95 = arith.addf %91, %94 : vector<16x32xf32>
    %96 = arith.addf %79, %95 : vector<16x32xf32>
    %c0_57 = arith.constant 0 : index
    %c0_58 = arith.constant 0 : index
    %c0_59 = arith.constant 0 : index
    %97 = vector.load %arg18[%c0_57, %c0_58, %c0_59] : memref<2x1x32xf32, #tpu.memory_space<vmem>>, vector<1x1x32xf32>
    %98 = vector.shape_cast %97 : vector<1x1x32xf32> to vector<1x32xf32>
    %c0_60 = arith.constant 0 : index
    %c0_61 = arith.constant 0 : index
    %c0_62 = arith.constant 0 : index
    %99 = vector.load %arg19[%c0_60, %c0_61, %c0_62] : memref<2x1x32xf32, #tpu.memory_space<vmem>>, vector<1x1x32xf32>
    %100 = vector.shape_cast %99 : vector<1x1x32xf32> to vector<1x32xf32>
    %cst_63 = arith.constant dense<0.000000e+00> : vector<16xf32>
    %101 = vector.multi_reduction <add>, %96, %cst_63 [1] : vector<16x32xf32> to vector<16xf32>
    %102 = vector.shape_cast %101 : vector<16xf32> to vector<16x1xf32>
    %cst_64 = arith.constant 3.200000e+01 : f32
    %103 = vector.broadcast %cst_64 : f32 to vector<16x1xf32>
    %104 = arith.divf %102, %103 : vector<16x1xf32>
    %105 = vector.broadcast %104 : vector<16x1xf32> to vector<16x32xf32>
    %106 = arith.subf %96, %105 : vector<16x32xf32>
    %107 = arith.mulf %106, %106 : vector<16x32xf32>
    %cst_65 = arith.constant dense<0.000000e+00> : vector<16xf32>
    %108 = vector.multi_reduction <add>, %107, %cst_65 [1] : vector<16x32xf32> to vector<16xf32>
    %109 = vector.shape_cast %108 : vector<16xf32> to vector<16x1xf32>
    %cst_66 = arith.constant 3.200000e+01 : f32
    %110 = vector.broadcast %cst_66 : f32 to vector<16x1xf32>
    %111 = arith.divf %109, %110 : vector<16x1xf32>
    %112 = vector.broadcast %104 : vector<16x1xf32> to vector<16x32xf32>
    %113 = arith.subf %96, %112 : vector<16x32xf32>
    %cst_67 = arith.constant 9.99999974E-6 : f32
    %114 = vector.broadcast %cst_67 : f32 to vector<16x1xf32>
    %115 = arith.addf %111, %114 : vector<16x1xf32>
    %116 = math.rsqrt %115 : vector<16x1xf32>
    %117 = vector.broadcast %116 : vector<16x1xf32> to vector<16x32xf32>
    %118 = arith.mulf %113, %117 : vector<16x32xf32>
    %119 = vector.broadcast %98 : vector<1x32xf32> to vector<16x32xf32>
    %120 = arith.mulf %118, %119 : vector<16x32xf32>
    %121 = vector.broadcast %100 : vector<1x32xf32> to vector<16x32xf32>
    %122 = arith.addf %120, %121 : vector<16x32xf32>
    %c1 = arith.constant 1 : index
    %c0_68 = arith.constant 0 : index
    %c0_69 = arith.constant 0 : index
    %123 = vector.load %arg8[%c1, %c0_68, %c0_69] : memref<2x32x96xf32, #tpu.memory_space<vmem>>, vector<1x32x96xf32>
    %124 = vector.shape_cast %123 : vector<1x32x96xf32> to vector<32x96xf32>
    %cst_70 = arith.constant dense<0.000000e+00> : vector<16x96xf32>
    %125 = tpu.matmul %122, %124, %cst_70 {dimension_numbers = #tpu.dot_dimension_numbers<[1], [0], [0], [1], [0, 0, 1, 1], [], []>} : vector<16x32xf32>, vector<32x96xf32>, vector<16x96xf32> -> vector<16x96xf32>
    %c1_71 = arith.constant 1 : index
    %c0_72 = arith.constant 0 : index
    %c0_73 = arith.constant 0 : index
    %126 = vector.load %arg9[%c1_71, %c0_72, %c0_73] : memref<2x1x96xf32, #tpu.memory_space<vmem>>, vector<1x1x96xf32>
    %127 = vector.shape_cast %126 : vector<1x1x96xf32> to vector<1x96xf32>
    %128 = vector.broadcast %127 : vector<1x96xf32> to vector<16x96xf32>
    %129 = arith.addf %125, %128 : vector<16x96xf32>
    %130 = vector.extract_strided_slice %129 {offsets = [0, 0], sizes = [16, 32], strides = [1, 1]} : vector<16x96xf32> to vector<16x32xf32>
    %131 = vector.extract_strided_slice %129 {offsets = [0, 32], sizes = [16, 32], strides = [1, 1]} : vector<16x96xf32> to vector<16x32xf32>
    %132 = vector.extract_strided_slice %129 {offsets = [0, 64], sizes = [16, 32], strides = [1, 1]} : vector<16x96xf32> to vector<16x32xf32>
    %133 = tpu.concatenate %130, %130, %130, %130 in 0 : vector<16x32xf32>, vector<16x32xf32>, vector<16x32xf32>, vector<16x32xf32> -> vector<64x32xf32>
    %134 = arith.mulf %133, %10 : vector<64x32xf32>
    "tpu.trace_start"() <{level = 10 : i32, message = "qd,kd->qk"}> : () -> ()
    %cst_74 = arith.constant dense<0.000000e+00> : vector<64x16xf32>
    %135 = tpu.matmul %134, %131, %cst_74 {dimension_numbers = #tpu.dot_dimension_numbers<[1], [1], [0], [0], [0, 0, 1, 0], [], []>} : vector<64x32xf32>, vector<16x32xf32>, vector<64x16xf32> -> vector<64x16xf32>
    "tpu.trace_stop"() : () -> ()
    %cst_75 = arith.constant 0.353553385 : f32
    %136 = vector.broadcast %cst_75 : f32 to vector<64x16xf32>
    %137 = arith.mulf %135, %136 : vector<64x16xf32>
    %138 = arith.addf %137, %11 : vector<64x16xf32>
    %cst_76 = arith.constant dense<0xFF800000> : vector<64xf32>
    %139 = vector.multi_reduction <maximumf>, %138, %cst_76 [1] : vector<64x16xf32> to vector<64xf32>
    %140 = vector.shape_cast %139 : vector<64xf32> to vector<64x1xf32>
    %141 = vector.broadcast %140 : vector<64x1xf32> to vector<64x16xf32>
    %142 = arith.subf %138, %141 : vector<64x16xf32>
    %143 = math.exp %142 : vector<64x16xf32>
    %cst_77 = arith.constant dense<0.000000e+00> : vector<64xf32>
    %144 = vector.multi_reduction <add>, %143, %cst_77 [1] : vector<64x16xf32> to vector<64xf32>
    %145 = vector.shape_cast %144 : vector<64xf32> to vector<64x1xf32>
    %146 = vector.broadcast %145 : vector<64x1xf32> to vector<64x16xf32>
    %147 = arith.divf %143, %146 : vector<64x16xf32>
    %cst_78 = arith.constant dense<0.000000e+00> : vector<64x32xf32>
    %148 = tpu.matmul %147, %132, %cst_78 {dimension_numbers = #tpu.dot_dimension_numbers<[1], [0], [0], [1], [0, 0, 1, 1], [], []>} : vector<64x16xf32>, vector<16x32xf32>, vector<64x32xf32> -> vector<64x32xf32>
    %149 = arith.mulf %148, %10 : vector<64x32xf32>
    %150 = vector.extract_strided_slice %149 {offsets = [0, 0], sizes = [16, 32], strides = [1, 1]} : vector<64x32xf32> to vector<16x32xf32>
    %151 = vector.extract_strided_slice %149 {offsets = [16, 0], sizes = [16, 32], strides = [1, 1]} : vector<64x32xf32> to vector<16x32xf32>
    %152 = arith.addf %150, %151 : vector<16x32xf32>
    %153 = vector.extract_strided_slice %149 {offsets = [32, 0], sizes = [16, 32], strides = [1, 1]} : vector<64x32xf32> to vector<16x32xf32>
    %154 = arith.addf %152, %153 : vector<16x32xf32>
    %155 = vector.extract_strided_slice %149 {offsets = [48, 0], sizes = [16, 32], strides = [1, 1]} : vector<64x32xf32> to vector<16x32xf32>
    %156 = arith.addf %154, %155 : vector<16x32xf32>
    %c1_79 = arith.constant 1 : index
    %c0_80 = arith.constant 0 : index
    %c0_81 = arith.constant 0 : index
    %157 = vector.load %arg10[%c1_79, %c0_80, %c0_81] : memref<2x32x32xf32, #tpu.memory_space<vmem>>, vector<1x32x32xf32>
    %158 = vector.shape_cast %157 : vector<1x32x32xf32> to vector<32x32xf32>
    %cst_82 = arith.constant dense<0.000000e+00> : vector<16x32xf32>
    %159 = tpu.matmul %156, %158, %cst_82 {dimension_numbers = #tpu.dot_dimension_numbers<[1], [0], [0], [1], [0, 0, 1, 1], [], []>} : vector<16x32xf32>, vector<32x32xf32>, vector<16x32xf32> -> vector<16x32xf32>
    %c1_83 = arith.constant 1 : index
    %c0_84 = arith.constant 0 : index
    %c0_85 = arith.constant 0 : index
    %160 = vector.load %arg11[%c1_83, %c0_84, %c0_85] : memref<2x1x32xf32, #tpu.memory_space<vmem>>, vector<1x1x32xf32>
    %161 = vector.shape_cast %160 : vector<1x1x32xf32> to vector<1x32xf32>
    %162 = vector.broadcast %161 : vector<1x32xf32> to vector<16x32xf32>
    %163 = arith.addf %159, %162 : vector<16x32xf32>
    %164 = arith.addf %122, %163 : vector<16x32xf32>
    %c1_86 = arith.constant 1 : index
    %c0_87 = arith.constant 0 : index
    %c0_88 = arith.constant 0 : index
    %165 = vector.load %arg12[%c1_86, %c0_87, %c0_88] : memref<2x1x32xf32, #tpu.memory_space<vmem>>, vector<1x1x32xf32>
    %166 = vector.shape_cast %165 : vector<1x1x32xf32> to vector<1x32xf32>
    %c1_89 = arith.constant 1 : index
    %c0_90 = arith.constant 0 : index
    %c0_91 = arith.constant 0 : index
    %167 = vector.load %arg13[%c1_89, %c0_90, %c0_91] : memref<2x1x32xf32, #tpu.memory_space<vmem>>, vector<1x1x32xf32>
    %168 = vector.shape_cast %167 : vector<1x1x32xf32> to vector<1x32xf32>
    %cst_92 = arith.constant dense<0.000000e+00> : vector<16xf32>
    %169 = vector.multi_reduction <add>, %164, %cst_92 [1] : vector<16x32xf32> to vector<16xf32>
    %170 = vector.shape_cast %169 : vector<16xf32> to vector<16x1xf32>
    %cst_93 = arith.constant 3.200000e+01 : f32
    %171 = vector.broadcast %cst_93 : f32 to vector<16x1xf32>
    %172 = arith.divf %170, %171 : vector<16x1xf32>
    %173 = vector.broadcast %172 : vector<16x1xf32> to vector<16x32xf32>
    %174 = arith.subf %164, %173 : vector<16x32xf32>
    %175 = arith.mulf %174, %174 : vector<16x32xf32>
    %cst_94 = arith.constant dense<0.000000e+00> : vector<16xf32>
    %176 = vector.multi_reduction <add>, %175, %cst_94 [1] : vector<16x32xf32> to vector<16xf32>
    %177 = vector.shape_cast %176 : vector<16xf32> to vector<16x1xf32>
    %cst_95 = arith.constant 3.200000e+01 : f32
    %178 = vector.broadcast %cst_95 : f32 to vector<16x1xf32>
    %179 = arith.divf %177, %178 : vector<16x1xf32>
    %180 = vector.broadcast %172 : vector<16x1xf32> to vector<16x32xf32>
    %181 = arith.subf %164, %180 : vector<16x32xf32>
    %cst_96 = arith.constant 9.99999974E-6 : f32
    %182 = vector.broadcast %cst_96 : f32 to vector<16x1xf32>
    %183 = arith.addf %179, %182 : vector<16x1xf32>
    %184 = math.rsqrt %183 : vector<16x1xf32>
    %185 = vector.broadcast %184 : vector<16x1xf32> to vector<16x32xf32>
    %186 = arith.mulf %181, %185 : vector<16x32xf32>
    %187 = vector.broadcast %166 : vector<1x32xf32> to vector<16x32xf32>
    %188 = arith.mulf %186, %187 : vector<16x32xf32>
    %189 = vector.broadcast %168 : vector<1x32xf32> to vector<16x32xf32>
    %190 = arith.addf %188, %189 : vector<16x32xf32>
    %c1_97 = arith.constant 1 : index
    %c0_98 = arith.constant 0 : index
    %c0_99 = arith.constant 0 : index
    %191 = vector.load %arg14[%c1_97, %c0_98, %c0_99] : memref<2x32x64xf32, #tpu.memory_space<vmem>>, vector<1x32x64xf32>
    %192 = vector.shape_cast %191 : vector<1x32x64xf32> to vector<32x64xf32>
    %cst_100 = arith.constant dense<0.000000e+00> : vector<16x64xf32>
    %193 = tpu.matmul %190, %192, %cst_100 {dimension_numbers = #tpu.dot_dimension_numbers<[1], [0], [0], [1], [0, 0, 1, 1], [], []>} : vector<16x32xf32>, vector<32x64xf32>, vector<16x64xf32> -> vector<16x64xf32>
    %c1_101 = arith.constant 1 : index
    %c0_102 = arith.constant 0 : index
    %c0_103 = arith.constant 0 : index
    %194 = vector.load %arg15[%c1_101, %c0_102, %c0_103] : memref<2x1x64xf32, #tpu.memory_space<vmem>>, vector<1x1x64xf32>
    %195 = vector.shape_cast %194 : vector<1x1x64xf32> to vector<1x64xf32>
    %196 = vector.broadcast %195 : vector<1x64xf32> to vector<16x64xf32>
    %197 = arith.addf %193, %196 : vector<16x64xf32>
    %cst_104 = arith.constant 0.000000e+00 : f32
    %198 = vector.broadcast %cst_104 : f32 to vector<16x64xf32>
    %199 = arith.maximumf %197, %198 : vector<16x64xf32>
    %c1_105 = arith.constant 1 : index
    %c0_106 = arith.constant 0 : index
    %c0_107 = arith.constant 0 : index
    %200 = vector.load %arg16[%c1_105, %c0_106, %c0_107] : memref<2x64x32xf32, #tpu.memory_space<vmem>>, vector<1x64x32xf32>
    %201 = vector.shape_cast %200 : vector<1x64x32xf32> to vector<64x32xf32>
    %cst_108 = arith.constant dense<0.000000e+00> : vector<16x32xf32>
    %202 = tpu.matmul %199, %201, %cst_108 {dimension_numbers = #tpu.dot_dimension_numbers<[1], [0], [0], [1], [0, 0, 1, 1], [], []>} : vector<16x64xf32>, vector<64x32xf32>, vector<16x32xf32> -> vector<16x32xf32>
    %c1_109 = arith.constant 1 : index
    %c0_110 = arith.constant 0 : index
    %c0_111 = arith.constant 0 : index
    %203 = vector.load %arg17[%c1_109, %c0_110, %c0_111] : memref<2x1x32xf32, #tpu.memory_space<vmem>>, vector<1x1x32xf32>
    %204 = vector.shape_cast %203 : vector<1x1x32xf32> to vector<1x32xf32>
    %205 = vector.broadcast %204 : vector<1x32xf32> to vector<16x32xf32>
    %206 = arith.addf %202, %205 : vector<16x32xf32>
    %207 = arith.addf %190, %206 : vector<16x32xf32>
    %c1_112 = arith.constant 1 : index
    %c0_113 = arith.constant 0 : index
    %c0_114 = arith.constant 0 : index
    %208 = vector.load %arg18[%c1_112, %c0_113, %c0_114] : memref<2x1x32xf32, #tpu.memory_space<vmem>>, vector<1x1x32xf32>
    %209 = vector.shape_cast %208 : vector<1x1x32xf32> to vector<1x32xf32>
    %c1_115 = arith.constant 1 : index
    %c0_116 = arith.constant 0 : index
    %c0_117 = arith.constant 0 : index
    %210 = vector.load %arg19[%c1_115, %c0_116, %c0_117] : memref<2x1x32xf32, #tpu.memory_space<vmem>>, vector<1x1x32xf32>
    %211 = vector.shape_cast %210 : vector<1x1x32xf32> to vector<1x32xf32>
    %cst_118 = arith.constant dense<0.000000e+00> : vector<16xf32>
    %212 = vector.multi_reduction <add>, %207, %cst_118 [1] : vector<16x32xf32> to vector<16xf32>
    %213 = vector.shape_cast %212 : vector<16xf32> to vector<16x1xf32>
    %cst_119 = arith.constant 3.200000e+01 : f32
    %214 = vector.broadcast %cst_119 : f32 to vector<16x1xf32>
    %215 = arith.divf %213, %214 : vector<16x1xf32>
    %216 = vector.broadcast %215 : vector<16x1xf32> to vector<16x32xf32>
    %217 = arith.subf %207, %216 : vector<16x32xf32>
    %218 = arith.mulf %217, %217 : vector<16x32xf32>
    %cst_120 = arith.constant dense<0.000000e+00> : vector<16xf32>
    %219 = vector.multi_reduction <add>, %218, %cst_120 [1] : vector<16x32xf32> to vector<16xf32>
    %220 = vector.shape_cast %219 : vector<16xf32> to vector<16x1xf32>
    %cst_121 = arith.constant 3.200000e+01 : f32
    %221 = vector.broadcast %cst_121 : f32 to vector<16x1xf32>
    %222 = arith.divf %220, %221 : vector<16x1xf32>
    %223 = vector.broadcast %215 : vector<16x1xf32> to vector<16x32xf32>
    %224 = arith.subf %207, %223 : vector<16x32xf32>
    %cst_122 = arith.constant 9.99999974E-6 : f32
    %225 = vector.broadcast %cst_122 : f32 to vector<16x1xf32>
    %226 = arith.addf %222, %225 : vector<16x1xf32>
    %227 = math.rsqrt %226 : vector<16x1xf32>
    %228 = vector.broadcast %227 : vector<16x1xf32> to vector<16x32xf32>
    %229 = arith.mulf %224, %228 : vector<16x32xf32>
    %230 = vector.broadcast %209 : vector<1x32xf32> to vector<16x32xf32>
    %231 = arith.mulf %229, %230 : vector<16x32xf32>
    %232 = vector.broadcast %211 : vector<1x32xf32> to vector<16x32xf32>
    %233 = arith.addf %231, %232 : vector<16x32xf32>
    %c0_123 = arith.constant 0 : index
    %c0_124 = arith.constant 0 : index
    %234 = vector.load %arg3[%c0_123, %c0_124] : memref<2x16xf32, #tpu.memory_space<vmem>>, vector<2x16xf32>
    %cst_125 = arith.constant dense<0.000000e+00> : vector<2x32xf32>
    %235 = tpu.matmul %234, %233, %cst_125 {dimension_numbers = #tpu.dot_dimension_numbers<[1], [0], [0], [1], [0, 0, 1, 1], [], []>} : vector<2x16xf32>, vector<16x32xf32>, vector<2x32xf32> -> vector<2x32xf32>
    %c0_126 = arith.constant 0 : index
    %c0_127 = arith.constant 0 : index
    %236 = vector.load %arg20[%c0_126, %c0_127] : memref<2x32xf32, #tpu.memory_space<vmem>>, vector<2x32xf32>
    tpu.vector_store %arg20[%c0_126, %c0_127], %235 {strides = array<i32>} : memref<2x32xf32, #tpu.memory_space<vmem>>, vector<2x32xf32>,
    return
  }
  func.func @transform_0(%arg0: i32) -> (i32, i32) {
    %c0_i32 = arith.constant 0 : i32
    %c0_i32_0 = arith.constant 0 : i32
    %c0_i32_1 = arith.constant 0 : i32
    return %c0_i32, %c0_i32_0 : i32, i32
  }
  func.func @transform_1(%arg0: i32) -> (i32, i32) {
    %c0_i32 = arith.constant 0 : i32
    %c0_i32_0 = arith.constant 0 : i32
    %c0_i32_1 = arith.constant 0 : i32
    return %c0_i32, %c0_i32_0 : i32, i32
  }
  func.func @transform_2(%arg0: i32) -> (i32, i32) {
    %c0_i32 = arith.constant 0 : i32
    %c0_i32_0 = arith.constant 0 : i32
    %c0_i32_1 = arith.constant 0 : i32
    return %c0_i32, %c0_i32_0 : i32, i32
  }
  func.func @transform_3(%arg0: i32) -> (i32, i32) {
    %c0_i32 = arith.constant 0 : i32
    %c0_i32_0 = arith.constant 0 : i32
    %c0_i32_1 = arith.constant 0 : i32
    return %c0_i32, %c0_i32_0 : i32, i32
  }
  func.func @transform_4(%arg0: i32) -> (i32, i32) {
    %c0_i32 = arith.constant 0 : i32
    %c0_i32_0 = arith.constant 0 : i32
    %c0_i32_1 = arith.constant 0 : i32
    return %c0_i32, %c0_i32_0 : i32, i32
  }
  func.func @transform_5(%arg0: i32) -> (i32, i32) {
    %c0_i32 = arith.constant 0 : i32
    %c0_i32_0 = arith.constant 0 : i32
    %c0_i32_1 = arith.constant 0 : i32
    return %c0_i32, %c0_i32_0 : i32, i32
  }
  func.func @transform_6(%arg0: i32) -> (i32, i32) {
    %c0_i32 = arith.constant 0 : i32
    %c0_i32_0 = arith.constant 0 : i32
    %c0_i32_1 = arith.constant 0 : i32
    return %c0_i32, %c0_i32_0 : i32, i32
  }
  func.func @transform_7(%arg0: i32) -> (i32, i32, i32) {
    %c0_i32 = arith.constant 0 : i32
    %c0_i32_0 = arith.constant 0 : i32
    %c0_i32_1 = arith.constant 0 : i32
    %c0_i32_2 = arith.constant 0 : i32
    return %c0_i32, %c0_i32_0, %c0_i32_1 : i32, i32, i32
  }
  func.func @transform_8(%arg0: i32) -> (i32, i32, i32) {
    %c0_i32 = arith.constant 0 : i32
    %c0_i32_0 = arith.constant 0 : i32
    %c0_i32_1 = arith.constant 0 : i32
    %c0_i32_2 = arith.constant 0 : i32
    return %c0_i32, %c0_i32_0, %c0_i32_1 : i32, i32, i32
  }
  func.func @transform_9(%arg0: i32) -> (i32, i32, i32) {
    %c0_i32 = arith.constant 0 : i32
    %c0_i32_0 = arith.constant 0 : i32
    %c0_i32_1 = arith.constant 0 : i32
    %c0_i32_2 = arith.constant 0 : i32
    return %c0_i32, %c0_i32_0, %c0_i32_1 : i32, i32, i32
  }
  func.func @transform_10(%arg0: i32) -> (i32, i32, i32) {
    %c0_i32 = arith.constant 0 : i32
    %c0_i32_0 = arith.constant 0 : i32
    %c0_i32_1 = arith.constant 0 : i32
    %c0_i32_2 = arith.constant 0 : i32
    return %c0_i32, %c0_i32_0, %c0_i32_1 : i32, i32, i32
  }
  func.func @transform_11(%arg0: i32) -> (i32, i32, i32) {
    %c0_i32 = arith.constant 0 : i32
    %c0_i32_0 = arith.constant 0 : i32
    %c0_i32_1 = arith.constant 0 : i32
    %c0_i32_2 = arith.constant 0 : i32
    return %c0_i32, %c0_i32_0, %c0_i32_1 : i32, i32, i32
  }
  func.func @transform_12(%arg0: i32) -> (i32, i32, i32) {
    %c0_i32 = arith.constant 0 : i32
    %c0_i32_0 = arith.constant 0 : i32
    %c0_i32_1 = arith.constant 0 : i32
    %c0_i32_2 = arith.constant 0 : i32
    return %c0_i32, %c0_i32_0, %c0_i32_1 : i32, i32, i32
  }
  func.func @transform_13(%arg0: i32) -> (i32, i32, i32) {
    %c0_i32 = arith.constant 0 : i32
    %c0_i32_0 = arith.constant 0 : i32
    %c0_i32_1 = arith.constant 0 : i32
    %c0_i32_2 = arith.constant 0 : i32
    return %c0_i32, %c0_i32_0, %c0_i32_1 : i32, i32, i32
  }
  func.func @transform_14(%arg0: i32) -> (i32, i32, i32) {
    %c0_i32 = arith.constant 0 : i32
    %c0_i32_0 = arith.constant 0 : i32
    %c0_i32_1 = arith.constant 0 : i32
    %c0_i32_2 = arith.constant 0 : i32
    return %c0_i32, %c0_i32_0, %c0_i32_1 : i32, i32, i32
  }
  func.func @transform_15(%arg0: i32) -> (i32, i32, i32) {
    %c0_i32 = arith.constant 0 : i32
    %c0_i32_0 = arith.constant 0 : i32
    %c0_i32_1 = arith.constant 0 : i32
    %c0_i32_2 = arith.constant 0 : i32
    return %c0_i32, %c0_i32_0, %c0_i32_1 : i32, i32, i32
  }
  func.func @transform_16(%arg0: i32) -> (i32, i32, i32) {
    %c0_i32 = arith.constant 0 : i32
    %c0_i32_0 = arith.constant 0 : i32
    %c0_i32_1 = arith.constant 0 : i32
    %c0_i32_2 = arith.constant 0 : i32
    return %c0_i32, %c0_i32_0, %c0_i32_1 : i32, i32, i32
  }
  func.func @transform_17(%arg0: i32) -> (i32, i32, i32) {
    %c0_i32 = arith.constant 0 : i32
    %c0_i32_0 = arith.constant 0 : i32
    %c0_i32_1 = arith.constant 0 : i32
    %c0_i32_2 = arith.constant 0 : i32
    return %c0_i32, %c0_i32_0, %c0_i32_1 : i32, i32, i32
  }
  func.func @transform_18(%arg0: i32) -> (i32, i32, i32) {
    %c0_i32 = arith.constant 0 : i32
    %c0_i32_0 = arith.constant 0 : i32
    %c0_i32_1 = arith.constant 0 : i32
    %c0_i32_2 = arith.constant 0 : i32
    return %c0_i32, %c0_i32_0, %c0_i32_1 : i32, i32, i32
  }
  func.func @transform_19(%arg0: i32) -> (i32, i32) {
    %c0_i32 = arith.constant 0 : i32
    %c0_i32_0 = arith.constant 0 : i32
    %c0_i32_1 = arith.constant 0 : i32
    return %c0_i32, %c0_i32_0 : i32, i32
  }
}

</mosaic_0001>

<bundles_post_ra>
// kernel: tpu_custom_call.1
= control target key start
LH: loop header
LB: loop body
LE: loop exit
PB: predicated region body
PF: predicated region fallthrough
CT: control target
= control target key end

     0   :  { %s3244_s0 = inlined_call_operand.vmem [shape: f32[16,16], index: 0, kind: input, shape index: {}]   ;;  %s3245_s1 = inlined_call_operand.vmem [shape: f32[16,32], index: 1, kind: input, shape index: {}]   ;;  %s3246_s2 = inlined_call_operand.vmem [shape: f32[2,16], index: 2, kind: input, shape index: {}]   ;;  %s3247_s3 = inlined_call_operand.vmem [shape: f32[64,32], index: 3, kind: input, shape index: {}]   ;;  %s3248_s4 = inlined_call_operand.vmem [shape: f32[64,16], index: 4, kind: input, shape index: {}]   ;;  %s3249_s5 = inlined_call_operand.vmem [shape: f32[16,32], index: 5, kind: input, shape index: {}]   ;;  %s3250_s6 = inlined_call_operand.vmem [shape: f32[1,32], index: 6, kind: input, shape index: {}]   ;;  %s3251_s7 = inlined_call_operand.vmem [shape: f32[2,32,96], index: 7, kind: input, shape index: {}]   ;;  %s3252_s8 = inlined_call_operand.vmem [shape: f32[2,1,96], index: 8, kind: input, shape index: {}]   ;;  %s3253_s9 = inlined_call_operand.vmem [shape: f32[2,32,32], index: 9, kind: input, shape index: {}]   ;;  %s3254_s10 = inlined_call_operand.vmem [shape: f32[2,1,32], index: 10, kind: input, shape index: {}]   ;;  %s3255_s11 = inlined_call_operand.vmem [shape: f32[2,1,32], index: 11, kind: input, shape index: {}]   ;;  %s3256_s12 = inlined_call_operand.vmem [shape: f32[2,1,32], index: 12, kind: input, shape index: {}]   ;;  %s3257_s13 = inlined_call_operand.vmem [shape: f32[2,32,64], index: 13, kind: input, shape index: {}]   ;;  %s3258_s14 = inlined_call_operand.vmem [shape: f32[2,1,64], index: 14, kind: input, shape index: {}]   ;;  %s3259_s15 = inlined_call_operand.vmem [shape: f32[2,64,32], index: 15, kind: input, shape index: {}]   ;;  %s3260_s16 = inlined_call_operand.vmem [shape: f32[2,1,32], index: 16, kind: input, shape index: {}]   ;;  %s3261_s17 = inlined_call_operand.vmem [shape: f32[2,1,32], index: 17, kind: input, shape index: {}]   ;;  %s3262_s18 = inlined_call_operand.vmem [shape: f32[2,1,32], index: 18, kind: input, shape index: {}]   ;;  %s3263_s19 = inlined_call_operand.hbm [shape: f32[2,32], index: 19, kind: output, shape index: {}]  }
   0x1   :  { %3267 = sst [smem:[#allocation5_spill]] %s3244_s0 }
   0x2   :  { %3268 = sst [smem:[#allocation6_spill]] %s3245_s1 }
   0x3   :  { %3269 = sst [smem:[#allocation7_spill]] %s3246_s2 }
   0x4   :  { %3270 = sst [smem:[#allocation8_spill]] %s3247_s3 }
   0x5   :  { %v65_v0 = vld [vmem:[%s3249_s5] sm:$0xff]  ;;  %v66_v1 = vld [vmem:[%s3249_s5 + $0x8] sm:$0xff]  ;;  %s3271_s2 = sld [smem:[#allocation5_spill]]  ;;  %vm74_vm0 = vcmask 130048  }
   0x6   :  { %v2400_v3 = vpack.c.bf16 %v66_v1, %v65_v0 }
   0xb   :  { %v63_v2 = vld [vmem:[%s3271_s2] sm:$0xff] }
   0xc   :  { %2222 = vmatprep.mubr.msk.f32.mxu0 %vm74_vm0, %v63_v2 }
   0xd   :  { %24 = vsyncpa [#allocation3], 0  ;;  %2401 = vmatprep.subr.bf16.mxu0 %v2400_v3  ;;  %v64_v4 = vld [vmem:[%s3271_s2 + $0x8] sm:$0xff]  ;;  %v178_v5 = vld [vmem:[%s3251_s7] sm:$0xff]  ;;  %s3272_s22 = sld [smem:[#allocation6_spill]]  ;;  %vm189_vm1 = vcmask 261120  }
   0xe   :  { %2403 = vmatpush3.bf16.msra.mxu0 %v2400_v3  ;;  %v179_v6 = vld [vmem:[%s3251_s7 + $0x8] sm:$0xff]  ;;  %v180_v8 = vld [vmem:[%s3251_s7 + $0x10] sm:$0xff]  ;;  %v181_v9 = vld [vmem:[%s3251_s7 + $0x18] sm:$0xff]  ;;  %s3273_s5 = sld [smem:[#allocation8_spill]]  ;;  %s2645_s26 = smov 96   ;;  %vm919_vm3 = vcmask 523264  }
   0xf   :  { %v2404_v7 = vpack.c.bf16 %v179_v6, %v178_v5  ;;  %v2408_v10 = vpack.c.bf16 %v181_v9, %v180_v8  ;;  %v2015_v11 = vld [vmem:[%s3250_s6] ss:$0 sm:$0xff]  ;;  %vm2810_vm2 = vmpackc.low %vm189_vm1, %vm189_vm1  ;;  %v2870_v50 = vld [vmem:[%s3248_s4 + $0x8] sm:$0xff]  ;;  %vm2648_vm4 = vmmov 0   ;;  %s2650_s21 = smov [#allocation2]   ;;  %vm1999_vm5 = vcmask 254976  }
  0x10   :  { %v2018_v22 = vld [vmem:[%s3252_s8] ss:$0 sm:$0xff]  ;;  %v2882_v58 = vld [vmem:[%s3248_s4 + $0x18] sm:$0xff]  ;;  %v2889_v0 = vld [vmem:[%s3248_s4 + $0x10] sm:$0xff] }
  0x11   :  { %2223 = vmatmul.mubr.msk.f32.vlgmr.msra.gmra.mrb[0].mxu0 %vm74_vm0, %v64_v4  ;;  %2405 = vmatprep.subr.bf16.mxu1 %v2404_v7  ;;  %v2875_v53 = vld [vmem:[%s3248_s4] sm:$0xff] }
  0x12   :  { %2407 = vmatpush3.bf16.msra.mxu1 %v2404_v7  ;;  %v2897_v7 = vld [vmem:[%s3248_s4 + $0x28] sm:$0xff] }
  0x13   :  { %2409 = vmatprep.subr.bf16.mxu1 %v2408_v10  ;;  %v158_v17 = vld [vmem:[%s3272_s22] sm:$0xff]  ;;  %v159_v18 = vld [vmem:[%s3272_s22 + $0x8] sm:$0xff] }
  0x14   :  { %v2800_v26 = vld [vmem:[%s3273_s5] sm:$0xff]  ;;  %v2821_v35 = vld [vmem:[%s3273_s5 + $0x8] sm:$0xff]  ;;  %v2826_v36 = vld [vmem:[%s3273_s5 + $0x10] sm:$0xff] }
  0x15   :  { %v2833_v39 = vld [vmem:[%s3273_s5 + $0x18] sm:$0xff]  ;;  %v2839_v40 = vld [vmem:[%s3273_s5 + $0x20] sm:$0xff]  ;;  %v2847_v43 = vld [vmem:[%s3273_s5 + $0x28] sm:$0xff] }
  0x16   :  { %2411 = vmatpush3.bf16.msra.mxu1 %v2408_v10  ;;  %v2853_v44 = vld [vmem:[%s3273_s5 + $0x30] sm:$0xff]  ;;  %v2861_v47 = vld [vmem:[%s3273_s5 + $0x38] sm:$0xff] }
  0xe4   :  { %v2224_v12 = vpop.f32.mrb[0].mxu0 }
  0xe5   :  { %v153_v13 = vadd.f32 %v2224_v12, %v2015_v11  ;;  %v147_v14 = vpop.f32.mrb[1].mxu0 }
  0xe6   :  { %v148_v15 = vadd.f32 %v2015_v11, %v147_v14 }
  0xe7   :  { %v157_v16 = vmul.f32 5.656854, %v153_v13  ;;  %v2904_v13 = vld [vmem:[%s3248_s4 + $0x20] sm:$0xff] }
  0xe8   :  { %v156_v19 = vmul.f32 5.656854, %v148_v15 }
  0xe9   :  { %v2788_v21 = vadd.f32 %v159_v18, %v157_v16 }
  0xea   :  { %v2786_v20 = vadd.f32 %v158_v17, %v156_v19  ;;  %v2911_v17 = vld [vmem:[%s3248_s4 + $0x30] sm:$0xff] }
  0xec   :  { %2233 = vmatprep.mubr.msk.f32.mxu1 %vm189_vm1, %v2786_v20 }
  0xed   :  { %2234 = vmatmul.mubr.msk.f32.vlgmr.msra.gmra.mrb[0].mxu1 %vm189_vm1, %v2788_v21 }
 0x1c0   :  { %v2235_v23 = vpop.f32.mrb[0].mxu1 }
 0x1c1   :  { %v268_v24 = vadd.f32 %v2235_v23, %v2018_v22  ;;  %v262_v25 = vpop.f32.mrb[1].mxu1  ;;  %v2918_v23 = vld [vmem:[%s3248_s4 + $0x38] sm:$0xff]  ;;  %s2646_s4 = smov 64  }
 0x1c2   :  { %v263_v27 = vadd.f32 %v2018_v22, %v262_v25 }
 0x1c3   :  { %v272_v37 = vmul.f32 %v268_v24, %v2821_v35  ;;  %v274_v41 = vmul.f32 %v268_v24, %v2833_v39  ;;  %v276_v45 = vmul.f32 %v268_v24, %v2847_v43  ;;  %v278_v48 = vmul.f32 %v268_v24, %v2861_v47 }
 0x1c4   :  { %v2802_v28 = vpack.i.bf16 %v268_v24, %v263_v27  ;;  %v271_v29 = vmul.f32 %v263_v27, %v2800_v26  ;;  %v273_v38 = vmul.f32 %v263_v27, %v2826_v36  ;;  %v275_v42 = vmul.f32 %v263_v27, %v2839_v40 }
 0x1c5   :  { %v277_v46 = vmul.f32 %v263_v27, %v2853_v44 }
 0x1c6   :  { %2514 = vrot.lane.b32.xlu0 %v2802_v28, %s2645_s26  ;;  %2240 = vmatprep.mubr.msk.f32.mxu0 %vm189_vm1, %v271_v29 }
 0x238   :  { %v2515_v30 = vpop.permute.xlu0 %2514 }
 0x239   :  { %v2517_v31 = vunpack.i.h.bf16 %v2515_v30  ;;  %v2516_v32 = vunpack.i.l.bf16 %v2515_v30 }
 0x23b   :  { %v2412_v34 = vpack.c.bf16 %v2517_v31, %v2516_v32 }
 0x23d   :  { %2414 = vmatprep.subr.msk.bf16.mxu0 %vm2810_vm2, %v2412_v34 }
 0x23e   :  { %2417 = vmatpush3.bf16.xpose.msk.msra.mxu0 %vm2810_vm2, %v2412_v34 }
 0x245   :  { %2241 = vmatmul.mubr.msk.f32.vlgmr.msra.gmra.mrb[2].mxu0 %vm189_vm1, %v272_v37 }
 0x246   :  { %2243 = vmatprep.mubr.msk.f32.mxu0 %vm189_vm1, %v273_v38 }
 0x249   :  { %2244 = vmatmul.mubr.msk.f32.gmra.mrb[4].mxu0 %vm189_vm1, %v274_v41 }
 0x24a   :  { %2246 = vmatprep.mubr.msk.f32.mxu0 %vm189_vm1, %v275_v42 }
 0x24d   :  { %2247 = vmatmul.mubr.msk.f32.gmra.mrb[6].mxu0 %vm189_vm1, %v276_v45 }
 0x24e   :  { %2249 = vmatprep.mubr.msk.f32.mxu0 %vm189_vm1, %v277_v46 }
 0x251   :  { %2250 = vmatmul.mubr.msk.f32.gmra.mrb[8].mxu0 %vm189_vm1, %v278_v48 }
 0x318   :  { %v2242_v49 = vpop.f32.mrb[2].mxu0 }
 0x319   :  { %v419_v51 = vmul.f32 0.35355338, %v2242_v49  ;;  %v379_v52 = vpop.f32.mrb[3].mxu0 }
 0x31a   :  { %v418_v54 = vmul.f32 0.35355338, %v379_v52 }
 0x31b   :  { %v427_v55 = vadd.f32 %v419_v51, %v2870_v50 }
 0x31c   :  { %v2245_v56 = vpop.f32.mrb[4].mxu0  ;;  %v426_v57 = vadd.f32 %v418_v54, %v2875_v53 }
 0x31d   :  { %v421_v59 = vmul.f32 0.35355338, %v2245_v56  ;;  %v389_v60 = vpop.f32.mrb[5].mxu0  ;;  %v437_v61 = vsel %vm74_vm0, %v427_v55, -inf }
 0x31e   :  { %v420_v62 = vmul.f32 0.35355338, %v389_v60  ;;  %438 = vmax.xlane.f32.xlu1 %v437_v61  ;;  %v434_v63 = vsel %vm74_vm0, %v426_v57, -inf }
 0x31f   :  { %435 = vmax.xlane.f32.xlu0 %v434_v63  ;;  %v429_v1 = vadd.f32 %v421_v59, %v2882_v58 }
 0x320   :  { %v2248_v2 = vpop.f32.mrb[6].mxu0  ;;  %v428_v6 = vadd.f32 %v420_v62, %v2889_v0 }
 0x321   :  { %v423_v3 = vmul.f32 0.35355338, %v2248_v2  ;;  %v399_v4 = vpop.f32.mrb[7].mxu0  ;;  %v443_v5 = vsel %vm74_vm0, %v429_v1, -inf }
 0x322   :  { %444 = vmax.xlane.f32.xlu1 %v443_v5  ;;  %v422_v9 = vmul.f32 0.35355338, %v399_v4  ;;  %v440_v11 = vsel %vm74_vm0, %v428_v6, -inf }
 0x323   :  { %v431_v12 = vadd.f32 %v423_v3, %v2897_v7 }
 0x324   :  { %v2251_v8 = vpop.f32.mrb[8].mxu0  ;;  %v430_v16 = vadd.f32 %v422_v9, %v2904_v13 }
 0x325   :  { %v409_v10 = vpop.f32.mrb[9].mxu0  ;;  %v449_v15 = vsel %vm74_vm0, %v431_v12, -inf  ;;  %v425_v18 = vmul.f32 0.35355338, %v2251_v8 }
 0x326   :  { %441 = vmax.xlane.f32.xlu1 %v440_v11  ;;  %v424_v14 = vmul.f32 0.35355338, %v409_v10  ;;  %v446_v19 = vsel %vm74_vm0, %v430_v16, -inf }
 0x327   :  { %v433_v25 = vadd.f32 %v425_v18, %v2918_v23 }
 0x328   :  { %v432_v22 = vadd.f32 %v424_v14, %v2911_v17 }
 0x329   :  { %v455_v27 = vsel %vm74_vm0, %v433_v25, -inf }
 0x32a   :  { %450 = vmax.xlane.f32.xlu1 %v449_v15  ;;  %v452_v24 = vsel %vm74_vm0, %v432_v22, -inf }
 0x32e   :  { %447 = vmax.xlane.f32.xlu1 %v446_v19 }
 0x332   :  { %453 = vmax.xlane.f32.xlu1 %v452_v24 }
 0x336   :  { %456 = vmax.xlane.f32.xlu1 %v455_v27 }
 0x3ab   :  { %v439_v29 = vpop.xlane.xlu1 %438 }
 0x3ac   :  { %v459_v30 = vsub.f32 %v427_v55, %v439_v29  ;;  %v436_v31 = vpop.xlane.xlu0 %435 }
 0x3ad   :  { %v458_v32 = vsub.f32 %v426_v57, %v436_v31 }
 0x3ae   :  { %v468_v34 = vmul.f32 1.442695, %v459_v30 }
 0x3af   :  { %v466_v37 = vmul.f32 1.442695, %v458_v32  ;;  %v445_v38 = vpop.xlane.xlu1 %444 }
 0x3b0   :  { %v461_v41 = vsub.f32 %v429_v1, %v445_v38 }
 0x3b1   :  { %2533 = vpow2.f32 %v466_v37 }
 0x3b2   :  { %2535 = vpow2.f32 %v468_v34  ;;  %v472_v42 = vmul.f32 1.442695, %v461_v41 }
 0x3b3   :  { %v442_v45 = vpop.xlane.xlu1 %441 }
 0x3b4   :  { %v460_v46 = vsub.f32 %v428_v6, %v442_v45  ;;  %2537 = vpow2.f32 %v472_v42 }
 0x3b6   :  { %v470_v48 = vmul.f32 1.442695, %v460_v46 }
 0x3b7   :  { %v451_v49 = vpop.xlane.xlu1 %450 }
 0x3b8   :  { %2539 = vpow2.f32 %v470_v48  ;;  %v463_v51 = vsub.f32 %v431_v12, %v451_v49 }
 0x3ba   :  { %v476_v52 = vmul.f32 1.442695, %v463_v51 }
 0x3bb   :  { %v2534_v54 = vpop.eup %2533  ;;  %v448_v56 = vpop.xlane.xlu1 %447 }
 0x3bc   :  { %2541 = vpow2.f32 %v476_v52  ;;  %v462_v55 = vsub.f32 %v430_v16, %v448_v56  ;;  %v482_v57 = vsel %vm74_vm0, %v2534_v54, 0.0  ;;  %v2536_v59 = vpop.eup %2535 }
 0x3bd   :  { %483 = vadd.xlane.f32.xlu1 %v482_v57  ;;  %v485_v63 = vsel %vm74_vm0, %v2536_v59, 0.0 }
 0x3be   :  { %v474_v60 = vmul.f32 1.442695, %v462_v55  ;;  %v2538_v1 = vpop.eup %2537 }
 0x3bf   :  { %v454_v61 = vpop.xlane.xlu1 %453  ;;  %v491_v8 = vsel %vm74_vm0, %v2538_v1, 0.0 }
 0x3c0   :  { %2543 = vpow2.f32 %v474_v60  ;;  %v464_v62 = vsub.f32 %v432_v22, %v454_v61 }
 0x3c1   :  { %486 = vadd.xlane.f32.xlu1 %v485_v63  ;;  %v671_v63 = vld [vmem:[%s3253_s9] sm:$0xff] }
 0x3c2   :  { %v2540_v2 = vpop.eup %2539  ;;  %v478_v3 = vmul.f32 1.442695, %v464_v62 }
 0x3c3   :  { %v457_v4 = vpop.xlane.xlu1 %456  ;;  %v488_v5 = vsel %vm74_vm0, %v2540_v2, 0.0 }
 0x3c4   :  { %2545 = vpow2.f32 %v478_v3  ;;  %v465_v6 = vsub.f32 %v433_v25, %v457_v4  ;;  %489 = vadd.xlane.f32.xlu0 %v488_v5  ;;  %v673_v3 = vld [vmem:[%s3253_s9 + $0x10] sm:$0xff]  ;;  %v674_v4 = vld [vmem:[%s3253_s9 + $0x18] sm:$0xff] }
 0x3c5   :  { %492 = vadd.xlane.f32.xlu1 %v491_v8  ;;  %v2426_v5 = vpack.c.bf16 %v674_v4, %v673_v3  ;;  %v812_v3 = vld [vmem:[%s3257_s13 + $0x10] sm:$0xff]  ;;  %v813_v4 = vld [vmem:[%s3257_s13 + $0x18] sm:$0xff] }
 0x3c6   :  { %v2542_v9 = vpop.eup %2541  ;;  %v480_v10 = vmul.f32 1.442695, %v465_v6 }
 0x3c7   :  { %v497_v11 = vsel %vm74_vm0, %v2542_v9, 0.0 }
 0x3c8   :  { %2547 = vpow2.f32 %v480_v10 }
 0x3c9   :  { %498 = vadd.xlane.f32.xlu1 %v497_v11 }
 0x3ca   :  { %v2544_v12 = vpop.eup %2543 }
 0x3cb   :  { %v494_v14 = vsel %vm74_vm0, %v2544_v12, 0.0 }
 0x3cc   :  { %495 = vadd.xlane.f32.xlu0 %v494_v14 }
 0x3ce   :  { %v2546_v15 = vpop.eup %2545 }
 0x3cf   :  { %v500_v16 = vsel %vm74_vm0, %v2546_v15, 0.0 }
 0x3d0   :  { %501 = vadd.xlane.f32.xlu0 %v500_v16 }
 0x3d2   :  { %v2548_v18 = vpop.eup %2547 }
 0x3d3   :  { %v503_v19 = vsel %vm74_vm0, %v2548_v18, 0.0 }
 0x3d4   :  { %504 = vadd.xlane.f32.xlu1 %v503_v19 }
 0x3e6   :  { %2519 = vrot.lane.b32.xlu0 %v2802_v28, %s2646_s4 }
 0x44a   :  { %v484_v22 = vpop.xlane.xlu1 %483 }
 0x44b   :  { %2549 = vrcp.f32 %v484_v22 }
 0x44e   :  { %v487_v24 = vpop.xlane.xlu1 %486 }
 0x44f   :  { %2551 = vrcp.f32 %v487_v24 }
 0x451   :  { %v490_v27 = vpop.xlane.xlu0 %489 }
 0x452   :  { %v493_v31 = vpop.xlane.xlu1 %492  ;;  %2553 = vrcp.f32 %v490_v27 }
 0x453   :  { %2555 = vrcp.f32 %v493_v31 }
 0x455   :  { %v2550_v25 = vpop.eup %2549 }
 0x456   :  { %v507_v29 = vmul.f32 %v2550_v25, %v2534_v54  ;;  %v499_v34 = vpop.xlane.xlu1 %498 }
 0x458   :  { %2256 = vmatprep.mubr.msk.f32.mxu1 %vm74_vm0, %v507_v29 }
 0x459   :  { %v496_v30 = vpop.xlane.xlu0 %495  ;;  %v2552_v45 = vpop.eup %2551 }
 0x45a   :  { %2557 = vrcp.f32 %v496_v30  ;;  %v509_v48 = vmul.f32 %v2552_v45, %v2536_v59 }
 0x45b   :  { %2559 = vrcp.f32 %v499_v34 }
 0x45c   :  { %v2554_v46 = vpop.eup %2553 }
 0x45d   :  { %v502_v32 = vpop.xlane.xlu0 %501  ;;  %v2556_v49 = vpop.eup %2555  ;;  %v511_v51 = vmul.f32 %v2554_v46, %v2540_v2 }
 0x45e   :  { %2561 = vrcp.f32 %v502_v32  ;;  %v513_v54 = vmul.f32 %v2556_v49, %v2538_v1  ;;  %v672_v1 = vld [vmem:[%s3253_s9 + $0x8] sm:$0xff] }
 0x45f   :  { %v2422_v2 = vpack.c.bf16 %v672_v1, %v671_v63  ;;  %v811_v1 = vld [vmem:[%s3257_s13 + $0x8] sm:$0xff] }
 0x461   :  { %v2520_v37 = vpop.permute.xlu0 %2519  ;;  %v505_v42 = vpop.xlane.xlu1 %504  ;;  %2423 = vmatprep.subr.bf16.mxu0 %v2422_v2 }
 0x462   :  { %v2522_v38 = vunpack.i.h.bf16 %v2520_v37  ;;  %v2521_v41 = vunpack.i.l.bf16 %v2520_v37  ;;  %2563 = vrcp.f32 %v505_v42  ;;  %2425 = vmatpush3.bf16.msra.mxu0 %v2422_v2 }
 0x463   :  { %2427 = vmatprep.subr.bf16.mxu0 %v2426_v5 }
 0x464   :  { %v2418_v28 = vpack.c.bf16 %v2522_v38, %v2521_v41  ;;  %v2558_v52 = vpop.eup %2557  ;;  %v2039_v41 = vld [vmem:[%s3254_s10] ss:$0 sm:$0xff] }
 0x465   :  { %v2560_v56 = vpop.eup %2559  ;;  %v515_v55 = vmul.f32 %v2558_v52, %v2544_v12 }
 0x466   :  { %2419 = vmatprep.subr.bf16.mxu1 %v2418_v28  ;;  %v517_v60 = vmul.f32 %v2560_v56, %v2542_v9  ;;  %2429 = vmatpush3.bf16.msra.mxu0 %v2426_v5  ;;  %v2434_v5 = vpack.c.bf16 %v813_v4, %v812_v3 }
 0x467   :  { %2421 = vmatpush3.bf16.msra.mxu1 %v2418_v28 }
 0x468   :  { %v2562_v57 = vpop.eup %2561 }
 0x469   :  { %v519_v62 = vmul.f32 %v2562_v57, %v2546_v15 }
 0x46a   :  { %2257 = vmatmul.mubr.msk.f32.vlgmr.msra.gmra.mrb[2].mxu1 %vm74_vm0, %v509_v48 }
 0x46b   :  { %2259 = vmatprep.mubr.msk.f32.mxu1 %vm74_vm0, %v511_v51 }
 0x46c   :  { %v2564_v61 = vpop.eup %2563 }
 0x46d   :  { %v521_v59 = vmul.f32 %v2564_v61, %v2548_v18 }
 0x46e   :  { %2260 = vmatmul.mubr.msk.f32.gmra.mrb[4].mxu1 %vm74_vm0, %v513_v54 }
 0x46f   :  { %2262 = vmatprep.mubr.msk.f32.mxu1 %vm74_vm0, %v515_v55 }
 0x472   :  { %2263 = vmatmul.mubr.msk.f32.gmra.mrb[6].mxu1 %vm74_vm0, %v517_v60 }
 0x473   :  { %2265 = vmatprep.mubr.msk.f32.mxu1 %vm74_vm0, %v519_v62 }
 0x476   :  { %2266 = vmatmul.mubr.msk.f32.gmra.mrb[8].mxu1 %vm74_vm0, %v521_v59 }
 0x53d   :  { %v2258_v6 = vpop.f32.mrb[2].mxu1 }
 0x53e   :  { %v618_v8 = vpop.f32.mrb[3].mxu1  ;;  %v658_v10 = vmul.f32 %v2258_v6, %v2821_v35  ;;  %v904_v6 = vld [vmem:[%s3259_s15] sm:$0xff] }
 0x53f   :  { %v657_v14 = vmul.f32 %v618_v8, %v2800_v26  ;;  %v905_v8 = vld [vmem:[%s3259_s15 + $0x8] sm:$0xff] }
 0x541   :  { %v2261_v9 = vpop.f32.mrb[4].mxu1 }
 0x542   :  { %v660_v11 = vmul.f32 %v2261_v9, %v2833_v39  ;;  %v628_v12 = vpop.f32.mrb[5].mxu1  ;;  %v906_v9 = vld [vmem:[%s3259_s15 + $0x10] sm:$0xff] }
 0x543   :  { %v659_v15 = vmul.f32 %v628_v12, %v2826_v36 }
 0x544   :  { %v666_v16 = vadd.f32 %v660_v11, %v658_v10  ;;  %v2438_v10 = vpack.c.bf16 %v905_v8, %v904_v6  ;;  %v907_v11 = vld [vmem:[%s3259_s15 + $0x18] sm:$0xff] }
 0x545   :  { %v665_v18 = vadd.f32 %v659_v15, %v657_v14  ;;  %v2264_v19 = vpop.f32.mrb[6].mxu1  ;;  %v2442_v12 = vpack.c.bf16 %v907_v11, %v906_v9  ;;  %v908_v14 = vld [vmem:[%s3259_s15 + $0x20] sm:$0xff]  ;;  %v909_v15 = vld [vmem:[%s3259_s15 + $0x28] sm:$0xff] }
 0x546   :  { %v662_v22 = vmul.f32 %v2264_v19, %v2847_v43  ;;  %v638_v24 = vpop.f32.mrb[7].mxu1  ;;  %2439 = vmatprep.subr.bf16.mxu0 %v2438_v10 }
 0x547   :  { %v661_v25 = vmul.f32 %v638_v24, %v2839_v40 }
 0x548   :  { %v668_v27 = vadd.f32 %v666_v16, %v662_v22  ;;  %v2446_v16 = vpack.c.bf16 %v909_v15, %v908_v14  ;;  %v2052_v15 = vld [vmem:[%s3251_s7 + $0x20] sm:$0xff] }
 0x549   :  { %v667_v29 = vadd.f32 %v665_v18, %v661_v25  ;;  %v2267_v30 = vpop.f32.mrb[8].mxu1 }
 0x54a   :  { %v664_v31 = vmul.f32 %v2267_v30, %v2861_v47  ;;  %v648_v32 = vpop.f32.mrb[9].mxu1  ;;  %v2042_v30 = vld [vmem:[%s3255_s11] ss:$0 sm:$0xff] }
 0x54b   :  { %v663_v34 = vmul.f32 %v648_v32, %v2853_v44  ;;  %v2043_v32 = vld [vmem:[%s3256_s12] ss:$0 sm:$0xff] }
 0x54c   :  { %v670_v37 = vadd.f32 %v668_v27, %v664_v31 }
 0x54d   :  { %v669_v38 = vadd.f32 %v667_v29, %v663_v34 }
 0x54f   :  { %2276 = vmatprep.mubr.msk.f32.mxu0 %vm189_vm1, %v669_v38 }
 0x550   :  { %2277 = vmatmul.mubr.msk.f32.vlgmr.msra.gmra.mrb[10].mxu0 %vm189_vm1, %v670_v37 }
 0x551   :  { %2441 = vmatpush3.bf16.msra.mxu0 %v2438_v10 }
 0x552   :  { %2443 = vmatprep.subr.bf16.mxu0 %v2442_v12 }
 0x555   :  { %2445 = vmatpush3.bf16.msra.mxu0 %v2442_v12 }
 0x556   :  { %2447 = vmatprep.subr.bf16.mxu0 %v2446_v16 }
 0x559   :  { %2449 = vmatpush3.bf16.msra.mxu0 %v2446_v16  ;;  %v2053_v16 = vld [vmem:[%s3251_s7 + $0x28] sm:$0xff] }
 0x623   :  { %v2278_v28 = vpop.f32.mrb[10].mxu0 }
 0x624   :  { %v754_v42 = vpop.f32.mrb[11].mxu0  ;;  %v760_v45 = vadd.f32 %v2278_v28, %v2039_v41 }
 0x625   :  { %v755_v46 = vadd.f32 %v2039_v41, %v754_v42 }
 0x626   :  { %v764_v51 = vadd.f32 %v760_v45, %v2788_v21  ;;  %v810_v21 = vld [vmem:[%s3257_s13] sm:$0xff]  ;;  %v910_v45 = vld [vmem:[%s3259_s15 + $0x30] sm:$0xff] }
 0x627   :  { %v763_v48 = vadd.f32 %v755_v46, %v2786_v20  ;;  %v2430_v2 = vpack.c.bf16 %v811_v1, %v810_v21  ;;  %v911_v46 = vld [vmem:[%s3259_s15 + $0x38] sm:$0xff] }
 0x628   :  { %v770_v52 = vsel %vm189_vm1, %v764_v51, 0.0 }
 0x629   :  { %v767_v49 = vsel %vm189_vm1, %v763_v48, 0.0  ;;  %2431 = vmatprep.subr.bf16.mxu1 %v2430_v2 }
 0x62a   :  { %768 = vadd.xlane.f32.xlu1 %v767_v49  ;;  %2433 = vmatpush3.bf16.msra.mxu1 %v2430_v2  ;;  %v2044_v49 = vld [vmem:[%s3258_s14] ss:$0 sm:$0xff] }
 0x62b   :  { %2435 = vmatprep.subr.bf16.mxu1 %v2434_v5 }
 0x62e   :  { %771 = vadd.xlane.f32.xlu1 %v770_v52  ;;  %2437 = vmatpush3.bf16.msra.mxu1 %v2434_v5 }
 0x6b7   :  { %v769_v54 = vpop.xlane.xlu1 %768 }
 0x6b8   :  { %v774_v56 = vmul.f32 0.03125, %v769_v54 }
 0x6ba   :  { %v776_v55 = vsub.f32 %v763_v48, %v774_v56  ;;  %v2450_v48 = vpack.c.bf16 %v911_v46, %v910_v45 }
 0x6bb   :  { %v772_v57 = vpop.xlane.xlu1 %771 }
 0x6bc   :  { %v775_v60 = vmul.f32 0.03125, %v772_v57  ;;  %v778_v61 = vmul.f32 %v776_v55, %v776_v55  ;;  %2451 = vmatprep.subr.bf16.mxu0 %v2450_v48 }
 0x6bd   :  { %2453 = vmatpush3.bf16.msra.mxu0 %v2450_v48 }
 0x6be   :  { %v777_v62 = vsub.f32 %v764_v51, %v775_v60  ;;  %v780_v59 = vsel %vm189_vm1, %v778_v61, 0.0  ;;  %v2047_v60 = vld [vmem:[%s3260_s16] ss:$0 sm:$0xff] }
 0x6bf   :  { %781 = vadd.xlane.f32.xlu1 %v780_v59 }
 0x6c0   :  { %v779_v63 = vmul.f32 %v777_v62, %v777_v62 }
 0x6c2   :  { %v783_v20 = vsel %vm189_vm1, %v779_v63, 0.0 }
 0x6c3   :  { %784 = vadd.xlane.f32.xlu1 %v783_v20 }
 0x74c   :  { %v782_v18 = vpop.xlane.xlu1 %781 }
 0x74d   :  { %v786_v19 = vmul.f32 0.03125, %v782_v18  ;;  %v2454_v18 = vpack.c.bf16 %v2053_v16, %v2052_v15 }
 0x74f   :  { %v788_v22 = vadd.f32 1e-05, %v786_v19  ;;  %2455 = vmatprep.subr.bf16.mxu1 %v2454_v18  ;;  %v2054_v19 = vld [vmem:[%s3251_s7 + $0x30] sm:$0xff] }
 0x750   :  { %v785_v24 = vpop.xlane.xlu1 %784 }
 0x751   :  { %2565 = vrsqrt.f32 %v788_v22  ;;  %v787_v25 = vmul.f32 0.03125, %v785_v24  ;;  %v2055_v22 = vld [vmem:[%s3251_s7 + $0x38] sm:$0xff] }
 0x752   :  { %v2458_v24 = vpack.c.bf16 %v2055_v22, %v2054_v19 }
 0x753   :  { %v789_v27 = vadd.f32 1e-05, %v787_v25 }
 0x755   :  { %2567 = vrsqrt.f32 %v789_v27 }
 0x75b   :  { %v2566_v29 = vpop.eup %2565 }
 0x75c   :  { %v792_v31 = vmul.f32 %v2566_v29, %v776_v55 }
 0x75e   :  { %v800_v34 = vmul.f32 %v2042_v30, %v792_v31 }
 0x75f   :  { %v2568_v37 = vpop.eup %2567 }
 0x760   :  { %v793_v38 = vmul.f32 %v2568_v37, %v777_v62  ;;  %v808_v41 = vadd.f32 %v2043_v32, %v800_v34  ;;  %v2050_v37 = vld [vmem:[%s3261_s17] ss:$0 sm:$0xff] }
 0x762   :  { %v801_v28 = vmul.f32 %v2042_v30, %v793_v38  ;;  %2287 = vmatprep.mubr.msk.f32.mxu1 %vm189_vm1, %v808_v41 }
 0x764   :  { %v809_v42 = vadd.f32 %v2043_v32, %v801_v28 }
 0x766   :  { %2288 = vmatmul.mubr.msk.f32.vlgmr.msra.gmra.mrb[10].mxu1 %vm189_vm1, %v809_v42 }
 0x767   :  { %2457 = vmatpush3.bf16.msra.mxu1 %v2454_v18 }
 0x768   :  { %2459 = vmatprep.subr.bf16.mxu1 %v2458_v24 }
 0x76b   :  { %2461 = vmatpush3.bf16.msra.mxu1 %v2458_v24 }
 0x839   :  { %v2289_v51 = vpop.f32.mrb[10].mxu1 }
 0x83a   :  { %v899_v52 = vadd.f32 %v2289_v51, %v2044_v49  ;;  %v893_v54 = vpop.f32.mrb[11].mxu1  ;;  %v2057_v51 = vld [vmem:[%s3252_s8 + $0x1] ss:$0 sm:$0xff] }
 0x83b   :  { %v894_v56 = vadd.f32 %v2044_v49, %v893_v54 }
 0x83c   :  { %v903_v57 = vmax.f32 %v899_v52, 0.0 }
 0x83d   :  { %v902_v55 = vmax.f32 %v894_v56, 0.0 }
 0x83f   :  { %2306 = vmatprep.mubr.msk.f32.mxu0 %vm919_vm3, %v902_v55 }
 0x840   :  { %2307 = vmatmul.mubr.msk.f32.vlgmr.msra.gmra.mrb[12].mxu0 %vm919_vm3, %v903_v57 }
 0x913   :  { %v2308_v61 = vpop.f32.mrb[12].mxu0 }
 0x914   :  { %v992_v62 = vpop.f32.mrb[13].mxu0  ;;  %v998_v59 = vadd.f32 %v2308_v61, %v2047_v60 }
 0x915   :  { %v993_v63 = vadd.f32 %v2047_v60, %v992_v62 }
 0x916   :  { %v1002_v1 = vadd.f32 %v998_v59, %v809_v42 }
 0x917   :  { %v1001_v20 = vadd.f32 %v993_v63, %v808_v41  ;;  %v2051_v41 = vld [vmem:[%s3262_s18] ss:$0 sm:$0xff] }
 0x918   :  { %v1008_v2 = vsel %vm189_vm1, %v1002_v1, 0.0 }
 0x919   :  { %v1005_v21 = vsel %vm189_vm1, %v1001_v20, 0.0 }
 0x91a   :  { %1006 = vadd.xlane.f32.xlu1 %v1005_v21 }
 0x91e   :  { %1009 = vadd.xlane.f32.xlu1 %v1008_v2 }
 0x9a7   :  { %v1007_v3 = vpop.xlane.xlu1 %1006 }
 0x9a8   :  { %v1011_v4 = vmul.f32 0.03125, %v1007_v3 }
 0x9aa   :  { %v1013_v5 = vsub.f32 %v1001_v20, %v1011_v4 }
 0x9ab   :  { %v1010_v6 = vpop.xlane.xlu1 %1009 }
 0x9ac   :  { %v1012_v8 = vmul.f32 0.03125, %v1010_v6  ;;  %v1015_v9 = vmul.f32 %v1013_v5, %v1013_v5 }
 0x9ae   :  { %v1014_v10 = vsub.f32 %v1002_v1, %v1012_v8  ;;  %v1017_v11 = vsel %vm189_vm1, %v1015_v9, 0.0 }
 0x9af   :  { %1018 = vadd.xlane.f32.xlu0 %v1017_v11 }
 0x9b0   :  { %v1016_v12 = vmul.f32 %v1014_v10, %v1014_v10 }
 0x9b2   :  { %v1020_v14 = vsel %vm189_vm1, %v1016_v12, 0.0 }
 0x9b3   :  { %1021 = vadd.xlane.f32.xlu1 %v1020_v14 }
 0xa3c   :  { %v1019_v25 = vpop.xlane.xlu0 %1018 }
 0xa3d   :  { %v1023_v27 = vmul.f32 0.03125, %v1019_v25 }
 0xa3f   :  { %v1025_v29 = vadd.f32 1e-05, %v1023_v27 }
 0xa40   :  { %v1022_v30 = vpop.xlane.xlu1 %1021 }
 0xa41   :  { %2569 = vrsqrt.f32 %v1025_v29  ;;  %v1024_v31 = vmul.f32 0.03125, %v1022_v30 }
 0xa43   :  { %v1026_v32 = vadd.f32 1e-05, %v1024_v31 }
 0xa45   :  { %2571 = vrsqrt.f32 %v1026_v32 }
 0xa4b   :  { %v2570_v34 = vpop.eup %2569 }
 0xa4c   :  { %v1029_v38 = vmul.f32 %v2570_v34, %v1013_v5 }
 0xa4e   :  { %v1037_v28 = vmul.f32 %v2050_v37, %v1029_v38 }
 0xa4f   :  { %v2572_v42 = vpop.eup %2571 }
 0xa50   :  { %v1030_v45 = vmul.f32 %v2572_v42, %v1014_v10  ;;  %v3046_v46 = vadd.f32 %v2051_v41, %v1037_v28 }
 0xa52   :  { %v1038_v48 = vmul.f32 %v2050_v37, %v1030_v45  ;;  %2317 = vmatprep.mubr.msk.f32.mxu1 %vm189_vm1, %v3046_v46 }
 0xa54   :  { %v3050_v49 = vadd.f32 %v2051_v41, %v1038_v48 }
 0xa56   :  { %2318 = vmatmul.mubr.msk.f32.vlgmr.msra.gmra.mrb[12].mxu1 %vm189_vm1, %v3050_v49 }
 0xb29   :  { %v2319_v52 = vpop.f32.mrb[12].mxu1 }
 0xb2a   :  { %v1138_v54 = vadd.f32 %v2319_v52, %v2057_v51  ;;  %v1132_v56 = vpop.f32.mrb[13].mxu1 }
 0xb2b   :  { %v1133_v55 = vadd.f32 %v2057_v51, %v1132_v56 }
 0xb2c   :  { %v1142_v20 = vmul.f32 %v1138_v54, %v2821_v35  ;;  %v1146_v2 = vmul.f32 %v1138_v54, %v2847_v43  ;;  %v1148_v35 = vmul.f32 %v1138_v54, %v2861_v47 }
 0xb2d   :  { %v3057_v57 = vpack.i.bf16 %v1138_v54, %v1133_v55  ;;  %v1141_v60 = vmul.f32 %v1133_v55, %v2800_v26  ;;  %v1143_v21 = vmul.f32 %v1133_v55, %v2826_v36  ;;  %v1144_v26 = vmul.f32 %v1138_v54, %v2833_v39 }
 0xb2e   :  { %v1145_v1 = vmul.f32 %v1133_v55, %v2839_v40  ;;  %v1147_v33 = vmul.f32 %v1133_v55, %v2853_v44 }
 0xb2f   :  { %2524 = vrot.lane.b32.xlu1 %v3057_v57, %s2645_s26  ;;  %2324 = vmatprep.mubr.msk.f32.mxu1 %vm189_vm1, %v1141_v60 }
 0xba1   :  { %v2525_v61 = vpop.permute.xlu1 %2524 }
 0xba2   :  { %v2527_v62 = vunpack.i.h.bf16 %v2525_v61  ;;  %v2526_v59 = vunpack.i.l.bf16 %v2525_v61 }
 0xba4   :  { %v2462_v63 = vpack.c.bf16 %v2527_v62, %v2526_v59 }
 0xba6   :  { %2464 = vmatprep.subr.msk.bf16.mxu1 %vm2810_vm2, %v2462_v63 }
 0xba7   :  { %2467 = vmatpush3.bf16.xpose.msk.msra.mxu1 %vm2810_vm2, %v2462_v63 }
 0xbae   :  { %2325 = vmatmul.mubr.msk.f32.vlgmr.msra.gmra.mrb[14].mxu1 %vm189_vm1, %v1142_v20 }
 0xbaf   :  { %2327 = vmatprep.mubr.msk.f32.mxu1 %vm189_vm1, %v1143_v21 }
 0xbb2   :  { %2328 = vmatmul.mubr.msk.f32.gmra.mrb[16].mxu1 %vm189_vm1, %v1144_v26 }
 0xbb3   :  { %2330 = vmatprep.mubr.msk.f32.mxu1 %vm189_vm1, %v1145_v1 }
 0xbb6   :  { %2331 = vmatmul.mubr.msk.f32.gmra.mrb[18].mxu1 %vm189_vm1, %v1146_v2 }
 0xbb7   :  { %2333 = vmatprep.mubr.msk.f32.mxu1 %vm189_vm1, %v1147_v33 }
 0xbba   :  { %2334 = vmatmul.mubr.msk.f32.gmra.mrb[20].mxu1 %vm189_vm1, %v1148_v35 }
 0xc81   :  { %v2326_v36 = vpop.f32.mrb[14].mxu1 }
 0xc82   :  { %v1289_v39 = vmul.f32 0.35355338, %v2326_v36  ;;  %v1249_v3 = vpop.f32.mrb[15].mxu1 }
 0xc83   :  { %v1288_v40 = vmul.f32 0.35355338, %v1249_v3 }
 0xc84   :  { %v1297_v4 = vadd.f32 %v1289_v39, %v2870_v50 }
 0xc85   :  { %v2329_v5 = vpop.f32.mrb[16].mxu1  ;;  %v1296_v6 = vadd.f32 %v1288_v40, %v2875_v53 }
 0xc86   :  { %v1291_v43 = vmul.f32 0.35355338, %v2329_v5  ;;  %v1259_v8 = vpop.f32.mrb[17].mxu1  ;;  %v1307_v44 = vsel %vm74_vm0, %v1297_v4, -inf }
 0xc87   :  { %v1290_v9 = vmul.f32 0.35355338, %v1259_v8  ;;  %1308 = vmax.xlane.f32.xlu0 %v1307_v44  ;;  %v1304_v10 = vsel %vm74_vm0, %v1296_v6, -inf }
 0xc88   :  { %1305 = vmax.xlane.f32.xlu1 %v1304_v10  ;;  %v1299_v47 = vadd.f32 %v1291_v43, %v2882_v58 }
 0xc89   :  { %v2332_v11 = vpop.f32.mrb[18].mxu1  ;;  %v1298_v50 = vadd.f32 %v1290_v9, %v2889_v0 }
 0xc8a   :  { %v1293_v12 = vmul.f32 0.35355338, %v2332_v11  ;;  %v1269_v14 = vpop.f32.mrb[19].mxu1  ;;  %v1313_v15 = vsel %vm74_vm0, %v1299_v47, -inf }
 0xc8b   :  { %1314 = vmax.xlane.f32.xlu0 %v1313_v15  ;;  %v1292_v16 = vmul.f32 0.35355338, %v1269_v14  ;;  %v1310_v19 = vsel %vm74_vm0, %v1298_v50, -inf }
 0xc8c   :  { %v1301_v22 = vadd.f32 %v1293_v12, %v2897_v7 }
 0xc8d   :  { %v2335_v53 = vpop.f32.mrb[20].mxu1  ;;  %v1300_v58 = vadd.f32 %v1292_v16, %v2904_v13 }
 0xc8e   :  { %v1279_v18 = vpop.f32.mrb[21].mxu1  ;;  %v1319_v25 = vsel %vm74_vm0, %v1301_v22, -inf  ;;  %v1295_v27 = vmul.f32 0.35355338, %v2335_v53 }
 0xc8f   :  { %1311 = vmax.xlane.f32.xlu0 %v1310_v19  ;;  %v1294_v24 = vmul.f32 0.35355338, %v1279_v18  ;;  %v1316_v29 = vsel %vm74_vm0, %v1300_v58, -inf }
 0xc90   :  { %v1303_v31 = vadd.f32 %v1295_v27, %v2918_v23 }
 0xc91   :  { %v1302_v0 = vadd.f32 %v1294_v24, %v2911_v17 }
 0xc92   :  { %v1325_v7 = vsel %vm74_vm0, %v1303_v31, -inf }
 0xc93   :  { %1320 = vmax.xlane.f32.xlu0 %v1319_v25  ;;  %v1322_v30 = vsel %vm74_vm0, %v1302_v0, -inf }
 0xc97   :  { %1317 = vmax.xlane.f32.xlu0 %v1316_v29 }
 0xc9b   :  { %1323 = vmax.xlane.f32.xlu0 %v1322_v30 }
 0xc9f   :  { %1326 = vmax.xlane.f32.xlu0 %v1325_v7 }
 0xd14   :  { %v1309_v32 = vpop.xlane.xlu0 %1308 }
 0xd15   :  { %v1329_v34 = vsub.f32 %v1297_v4, %v1309_v32  ;;  %v1306_v37 = vpop.xlane.xlu1 %1305 }
 0xd16   :  { %v1328_v38 = vsub.f32 %v1296_v6, %v1306_v37 }
 0xd17   :  { %v1338_v13 = vmul.f32 1.442695, %v1329_v34 }
 0xd18   :  { %v1336_v41 = vmul.f32 1.442695, %v1328_v38  ;;  %v1315_v28 = vpop.xlane.xlu0 %1314 }
 0xd19   :  { %2573 = vpow2.f32 %v1338_v13  ;;  %v1331_v42 = vsub.f32 %v1299_v47, %v1315_v28  ;;  %v2078_v28 = vld [vmem:[%s3253_s9 + $0x20] sm:$0xff] }
 0xd1a   :  { %2575 = vpow2.f32 %v1336_v41 }
 0xd1b   :  { %v1342_v17 = vmul.f32 1.442695, %v1331_v42  ;;  %v2079_v42 = vld [vmem:[%s3253_s9 + $0x28] sm:$0xff] }
 0xd1c   :  { %v1312_v45 = vpop.xlane.xlu0 %1311 }
 0xd1d   :  { %2577 = vpow2.f32 %v1342_v17  ;;  %v1330_v48 = vsub.f32 %v1298_v50, %v1312_v45  ;;  %v2472_v17 = vpack.c.bf16 %v2079_v42, %v2078_v28  ;;  %v2080_v45 = vld [vmem:[%s3253_s9 + $0x30] sm:$0xff]  ;;  %v2101_v42 = vld [vmem:[%s3259_s15 + $0x58] sm:$0xff] }
 0xd1f   :  { %v1340_v51 = vmul.f32 1.442695, %v1330_v48  ;;  %2473 = vmatprep.subr.bf16.mxu1 %v2472_v17  ;;  %v2081_v48 = vld [vmem:[%s3253_s9 + $0x38] sm:$0xff]  ;;  %s3276_s9 = sld [smem:[#allocation7_spill]] }
 0xd20   :  { %v1321_v23 = vpop.xlane.xlu0 %1320  ;;  %2475 = vmatpush3.bf16.msra.mxu1 %v2472_v17 }
 0xd21   :  { %2579 = vpow2.f32 %v1340_v51  ;;  %v1333_v52 = vsub.f32 %v1301_v22, %v1321_v23  ;;  %v2476_v51 = vpack.c.bf16 %v2081_v48, %v2080_v45  ;;  %v2102_v45 = vld [vmem:[%s3259_s15 + $0x60] sm:$0xff]  ;;  %v2103_v48 = vld [vmem:[%s3259_s15 + $0x68] sm:$0xff] }
 0xd23   :  { %v3097_v54 = vpop.eup %2573  ;;  %v1346_v56 = vmul.f32 1.442695, %v1333_v52  ;;  %2477 = vmatprep.subr.bf16.mxu1 %v2476_v51 }
 0xd24   :  { %v2576_v55 = vpop.eup %2575  ;;  %v1318_v60 = vpop.xlane.xlu0 %1317  ;;  %v1355_v61 = vsel %vm74_vm0, %v3097_v54, 0.0  ;;  %2479 = vmatpush3.bf16.msra.mxu1 %v2476_v51  ;;  %v2496_v51 = vpack.c.bf16 %v2103_v48, %v2102_v45 }
 0xd25   :  { %2581 = vpow2.f32 %v1346_v56  ;;  %v1332_v62 = vsub.f32 %v1300_v58, %v1318_v60  ;;  %1356 = vadd.xlane.f32.xlu1 %v1355_v61  ;;  %v1352_v59 = vsel %vm74_vm0, %v2576_v55, 0.0  ;;  %v2613_v56 = vld [vmem:[%s3273_s5 + $0x8] sm:$0xff]  ;;  %v2614_v60 = vld [vmem:[%s3273_s5 + $0x18] sm:$0xff] }
 0xd26   :  { %1353 = vadd.xlane.f32.xlu0 %v1352_v59  ;;  %v2615_v59 = vld [vmem:[%s3273_s5] sm:$0xff] }
 0xd27   :  { %v2578_v63 = vpop.eup %2577  ;;  %v1344_v20 = vmul.f32 1.442695, %v1332_v62 }
 0xd28   :  { %v1324_v21 = vpop.xlane.xlu0 %1323  ;;  %v1361_v26 = vsel %vm74_vm0, %v2578_v63, 0.0 }
 0xd29   :  { %2583 = vpow2.f32 %v1344_v20  ;;  %v1334_v1 = vsub.f32 %v1302_v0, %v1324_v21  ;;  %1362 = vadd.xlane.f32.xlu1 %v1361_v26  ;;  %v2616_v20 = vld [vmem:[%s3273_s5 + $0x10] sm:$0xff] }
 0xd2b   :  { %v2580_v2 = vpop.eup %2579  ;;  %v1348_v33 = vmul.f32 1.442695, %v1334_v1 }
 0xd2c   :  { %v1327_v35 = vpop.xlane.xlu0 %1326  ;;  %v1358_v36 = vsel %vm74_vm0, %v2580_v2, 0.0 }
 0xd2d   :  { %2585 = vpow2.f32 %v1348_v33  ;;  %v1335_v39 = vsub.f32 %v1303_v31, %v1327_v35  ;;  %1359 = vadd.xlane.f32.xlu0 %v1358_v36  ;;  %v2617_v33 = vld [vmem:[%s3273_s5 + $0x28] sm:$0xff] }
 0xd2f   :  { %v2582_v3 = vpop.eup %2581  ;;  %v1350_v40 = vmul.f32 1.442695, %v1335_v39  ;;  %v2618_v39 = vld [vmem:[%s3273_s5 + $0x20] sm:$0xff] }
 0xd30   :  { %v1367_v4 = vsel %vm74_vm0, %v2582_v3, 0.0 }
 0xd31   :  { %2587 = vpow2.f32 %v1350_v40  ;;  %1368 = vadd.xlane.f32.xlu1 %v1367_v4 }
 0xd33   :  { %v2584_v5 = vpop.eup %2583 }
 0xd34   :  { %v1364_v6 = vsel %vm74_vm0, %v2584_v5, 0.0 }
 0xd35   :  { %1365 = vadd.xlane.f32.xlu0 %v1364_v6  ;;  %v2619_v6 = vld [vmem:[%s3273_s5 + $0x38] sm:$0xff] }
 0xd37   :  { %v2586_v43 = vpop.eup %2585 }
 0xd38   :  { %v1370_v8 = vsel %vm74_vm0, %v2586_v43, 0.0 }
 0xd39   :  { %1371 = vadd.xlane.f32.xlu0 %v1370_v8 }
 0xd3b   :  { %v2588_v44 = vpop.eup %2587 }
 0xd3c   :  { %v1373_v9 = vsel %vm74_vm0, %v2588_v44, 0.0 }
 0xd3d   :  { %1374 = vadd.xlane.f32.xlu1 %v1373_v9 }
 0xd4f   :  { %2529 = vrot.lane.b32.xlu0 %v3057_v57, %s2646_s4 }
 0xdb2   :  { %v1357_v12 = vpop.xlane.xlu1 %1356 }
 0xdb3   :  { %v1354_v10 = vpop.xlane.xlu0 %1353 }
 0xdb4   :  { %2589 = vrcp.f32 %v1354_v10 }
 0xdb5   :  { %2591 = vrcp.f32 %v1357_v12 }
 0xdb6   :  { %v1363_v50 = vpop.xlane.xlu1 %1362 }
 0xdba   :  { %v1360_v11 = vpop.xlane.xlu0 %1359 }
 0xdbb   :  { %2593 = vrcp.f32 %v1360_v11  ;;  %v2083_v11 = vld [vmem:[%s3254_s10 + $0x1] ss:$0 sm:$0xff] }
 0xdbc   :  { %2595 = vrcp.f32 %v1363_v50 }
 0xdbe   :  { %v2590_v47 = vpop.eup %2589  ;;  %v1369_v16 = vpop.xlane.xlu1 %1368 }
 0xdbf   :  { %v1377_v14 = vmul.f32 %v2590_v47, %v2576_v55  ;;  %v2592_v25 = vpop.eup %2591 }
 0xdc0   :  { %v1379_v27 = vmul.f32 %v2592_v25, %v3097_v54 }
 0xdc1   :  { %2340 = vmatprep.mubr.msk.f32.mxu0 %vm74_vm0, %v1377_v14 }
 0xdc2   :  { %v1366_v15 = vpop.xlane.xlu0 %1365 }
 0xdc3   :  { %2597 = vrcp.f32 %v1366_v15 }
 0xdc4   :  { %2599 = vrcp.f32 %v1369_v16 }
 0xdc5   :  { %v2594_v58 = vpop.eup %2593 }
 0xdc6   :  { %v1372_v53 = vpop.xlane.xlu0 %1371  ;;  %v2596_v29 = vpop.eup %2595  ;;  %v1381_v0 = vmul.f32 %v2594_v58, %v2580_v2 }
 0xdc7   :  { %2601 = vrcp.f32 %v1372_v53  ;;  %v1383_v31 = vmul.f32 %v2596_v29, %v2578_v63 }
 0xdca   :  { %v2530_v18 = vpop.permute.xlu0 %2529  ;;  %v1375_v57 = vpop.xlane.xlu1 %1374 }
 0xdcb   :  { %v2532_v19 = vunpack.i.h.bf16 %v2530_v18  ;;  %v2531_v22 = vunpack.i.l.bf16 %v2530_v18  ;;  %2603 = vrcp.f32 %v1375_v57 }
 0xdcd   :  { %v2468_v24 = vpack.c.bf16 %v2532_v19, %v2531_v22  ;;  %v2598_v30 = vpop.eup %2597 }
 0xdce   :  { %v2600_v7 = vpop.eup %2599  ;;  %v1385_v32 = vmul.f32 %v2598_v30, %v2584_v5 }
 0xdcf   :  { %2469 = vmatprep.subr.bf16.mxu0 %v2468_v24  ;;  %v1387_v37 = vmul.f32 %v2600_v7, %v2582_v3 }
 0xdd0   :  { %2471 = vmatpush3.bf16.msra.mxu0 %v2468_v24 }
 0xdd1   :  { %v2602_v34 = vpop.eup %2601 }
 0xdd2   :  { %v1389_v13 = vmul.f32 %v2602_v34, %v2586_v43  ;;  %v2093_v34 = vld [vmem:[%s3257_s13 + $0x38] sm:$0xff] }
 0xdd3   :  { %2341 = vmatmul.mubr.msk.f32.vlgmr.msra.gmra.mrb[14].mxu0 %vm74_vm0, %v1379_v27 }
 0xdd4   :  { %2343 = vmatprep.mubr.msk.f32.mxu0 %vm74_vm0, %v1381_v0 }
 0xdd5   :  { %v2604_v38 = vpop.eup %2603 }
 0xdd6   :  { %v1391_v41 = vmul.f32 %v2604_v38, %v2588_v44  ;;  %v2620_v44 = vld [vmem:[%s3273_s5 + $0x30] sm:$0xff]  ;;  %v2098_v38 = vld [vmem:[%s3259_s15 + $0x40] sm:$0xff] }
 0xdd7   :  { %2344 = vmatmul.mubr.msk.f32.gmra.mrb[16].mxu0 %vm74_vm0, %v1383_v31  ;;  %v2091_v31 = vld [vmem:[%s3257_s13 + $0x28] sm:$0xff] }
 0xdd8   :  { %2346 = vmatprep.mubr.msk.f32.mxu0 %vm74_vm0, %v1385_v32  ;;  %v2092_v32 = vld [vmem:[%s3257_s13 + $0x30] sm:$0xff] }
 0xddb   :  { %2347 = vmatmul.mubr.msk.f32.gmra.mrb[18].mxu0 %vm74_vm0, %v1387_v37  ;;  %v2484_v37 = vpack.c.bf16 %v2093_v34, %v2092_v32 }
 0xddc   :  { %2349 = vmatprep.mubr.msk.f32.mxu0 %vm74_vm0, %v1389_v13  ;;  %v2099_v13 = vld [vmem:[%s3259_s15 + $0x48] sm:$0xff] }
 0xddd   :  { %v2488_v28 = vpack.c.bf16 %v2099_v13, %v2098_v38  ;;  %v2112_v38 = vld [vmem:[%s3261_s17 + $0x1] ss:$0 sm:$0xff]  ;;  %s2007_s17 = sshll.u32 %s2650_s21, 4  ;;  %s2008_s17 = int_to_ptr.vmem [resolvable:$true] %s2007_s17 }
 0xdde   :  { %s2621_s1 = scalar_lea.vmem %s2008_s17, 32  ;;  %p2626_p1 = scmp.lt.s32.totalorder %s2008_s17, %s2008_s17 }
 0xddf   :  { %2350 = vmatmul.mubr.msk.f32.gmra.mrb[20].mxu0 %vm74_vm0, %v1391_v41  ;;  %v2100_v41 = vld [vmem:[%s3259_s15 + $0x50] sm:$0xff]  ;;  %2489 = vmatprep.subr.bf16.mxu1 %v2488_v28  ;;  %p2622_p0 = scmp.ne.s32.totalorder %s2008_s17, %s2621_s1  ;;  %p2627_p2 = scmp.lt.s32.totalorder %s2621_s1, %s2621_s1 }
 0xde0   :  { %v2492_v17 = vpack.c.bf16 %v2101_v42, %v2100_v41  ;;  %v2113_v42 = vld [vmem:[%s3262_s18 + $0x1] ss:$0 sm:$0xff] }
 0xde1   :  { %p2628_p3 = por %p2627_p2, %p2626_p1 }
 0xde3   :  { %p2629_p4 = pnand %p2628_p3, %p2622_p0 }
 0xea6   :  { %v2342_v23 = vpop.f32.mrb[14].mxu0 }
 0xea7   :  { %v1488_v52 = vpop.f32.mrb[15].mxu0  ;;  %v1528_v55 = vmul.f32 %v2613_v56, %v2342_v23 }
 0xea8   :  { %v1527_v63 = vmul.f32 %v2615_v59, %v1488_v52 }
 0xeaa   :  { %v2345_v54 = vpop.f32.mrb[16].mxu0 }
 0xeab   :  { %v1530_v61 = vmul.f32 %v2614_v60, %v2345_v54  ;;  %v1498_v62 = vpop.f32.mrb[17].mxu0 }
 0xeac   :  { %v1529_v21 = vmul.f32 %v2616_v20, %v1498_v62  ;;  %v2088_v62 = vld [vmem:[%s3255_s11 + $0x1] ss:$0 sm:$0xff] }
 0xead   :  { %v1536_v26 = vadd.f32 %v1530_v61, %v1528_v55 }
 0xeae   :  { %v1535_v1 = vadd.f32 %v1529_v21, %v1527_v63  ;;  %v2348_v2 = vpop.f32.mrb[18].mxu0  ;;  %v2089_v63 = vld [vmem:[%s3256_s12 + $0x1] ss:$0 sm:$0xff] }
 0xeaf   :  { %v1532_v35 = vmul.f32 %v2617_v33, %v2348_v2  ;;  %v1508_v36 = vpop.f32.mrb[19].mxu0 }
 0xeb0   :  { %v1531_v3 = vmul.f32 %v2618_v39, %v1508_v36  ;;  %v2105_v36 = vld [vmem:[%s3259_s15 + $0x78] sm:$0xff] }
 0xeb1   :  { %v1538_v40 = vadd.f32 %v1536_v26, %v1532_v35  ;;  %v2104_v35 = vld [vmem:[%s3259_s15 + $0x70] sm:$0xff] }
 0xeb2   :  { %v1537_v4 = vadd.f32 %v1535_v1, %v1531_v3  ;;  %v2351_v5 = vpop.f32.mrb[20].mxu0  ;;  %v2500_v39 = vpack.c.bf16 %v2105_v36, %v2104_v35  ;;  %v2095_v3 = vld [vmem:[%s3258_s14 + $0x1] ss:$0 sm:$0xff] }
 0xeb3   :  { %v1534_v43 = vmul.f32 %v2619_v6, %v2351_v5  ;;  %v1518_v8 = vpop.f32.mrb[21].mxu0 }
 0xeb4   :  { %v1533_v9 = vmul.f32 %v2620_v44, %v1518_v8  ;;  %v2107_v44 = vld [vmem:[%s3260_s16 + $0x1] ss:$0 sm:$0xff] }
 0xeb5   :  { %v1540_v10 = vadd.f32 %v1538_v40, %v1534_v43 }
 0xeb6   :  { %v1539_v47 = vadd.f32 %v1537_v4, %v1533_v9 }
 0xeb8   :  { %2360 = vmatprep.mubr.msk.f32.mxu1 %vm189_vm1, %v1539_v47 }
 0xeb9   :  { %2361 = vmatmul.mubr.msk.f32.vlgmr.msra.gmra.mrb[22].mxu1 %vm189_vm1, %v1540_v10 }
 0xeba   :  { %2491 = vmatpush3.bf16.msra.mxu1 %v2488_v28 }
 0xebb   :  { %2493 = vmatprep.subr.bf16.mxu1 %v2492_v17 }
 0xebe   :  { %2495 = vmatpush3.bf16.msra.mxu1 %v2492_v17 }
 0xebf   :  { %2497 = vmatprep.subr.bf16.mxu1 %v2496_v51 }
 0xec2   :  { %2499 = vmatpush3.bf16.msra.mxu1 %v2496_v51 }
 0xec3   :  { %2501 = vmatprep.subr.bf16.mxu1 %v2500_v39 }
 0xec6   :  { %2503 = vmatpush3.bf16.msra.mxu1 %v2500_v39 }
 0xf8c   :  { %v2362_v12 = vpop.f32.mrb[22].mxu1 }
 0xf8d   :  { %v1626_v14 = vpop.f32.mrb[23].mxu1  ;;  %v1632_v15 = vadd.f32 %v2362_v12, %v2083_v11 }
 0xf8e   :  { %v1627_v50 = vadd.f32 %v2083_v11, %v1626_v14 }
 0xf8f   :  { %v1636_v18 = vadd.f32 %v1632_v15, %v3050_v49  ;;  %v2090_v49 = vld [vmem:[%s3257_s13 + $0x20] sm:$0xff] }
 0xf90   :  { %v1635_v53 = vadd.f32 %v1627_v50, %v3046_v46  ;;  %v2480_v7 = vpack.c.bf16 %v2091_v31, %v2090_v49 }
 0xf91   :  { %v1644_v19 = vsel %vm189_vm1, %v1636_v18, 0.0 }
 0xf92   :  { %v1641_v16 = vsel %vm189_vm1, %v1635_v53, 0.0  ;;  %2481 = vmatprep.subr.bf16.mxu0 %v2480_v7 }
 0xf93   :  { %1642 = vadd.xlane.f32.xlu1 %v1641_v16  ;;  %2483 = vmatpush3.bf16.msra.mxu0 %v2480_v7 }
 0xf94   :  { %2485 = vmatprep.subr.bf16.mxu0 %v2484_v37 }
 0xf97   :  { %1645 = vadd.xlane.f32.xlu1 %v1644_v19  ;;  %2487 = vmatpush3.bf16.msra.mxu0 %v2484_v37 }
0x1020   :  { %v1643_v22 = vpop.xlane.xlu1 %1642 }
0x1021   :  { %v1647_v57 = vmul.f32 0.03125, %v1643_v22 }
0x1023   :  { %v1649_v24 = vsub.f32 %v1635_v53, %v1647_v57 }
0x1024   :  { %v1646_v25 = vpop.xlane.xlu1 %1645 }
0x1025   :  { %v1648_v58 = vmul.f32 0.03125, %v1646_v25  ;;  %v1651_v27 = vmul.f32 %v1649_v24, %v1649_v24 }
0x1027   :  { %v1650_v29 = vsub.f32 %v1636_v18, %v1648_v58  ;;  %v1653_v0 = vsel %vm189_vm1, %v1651_v27, 0.0 }
0x1028   :  { %1654 = vadd.xlane.f32.xlu1 %v1653_v0  ;;  %v2649_v0 = vmov 0.0  }
0x1029   :  { %v1652_v30 = vmul.f32 %v1650_v29, %v1650_v29 }
0x102b   :  { %v1656_v46 = vsel %vm189_vm1, %v1652_v30, 0.0 }
0x102c   :  { %1657 = vadd.xlane.f32.xlu1 %v1656_v46 }
0x10b5   :  { %v1655_v23 = vpop.xlane.xlu1 %1654 }
0x10b6   :  { %v1659_v52 = vmul.f32 0.03125, %v1655_v23  ;;  %v1925_v23 = vld [vmem:[%s3276_s9] sm:$0x3] }
0x10b8   :  { %v1661_v54 = vadd.f32 1e-05, %v1659_v52 }
0x10b9   :  { %v1658_v56 = vpop.xlane.xlu1 %1657 }
0x10ba   :  { %2605 = vrsqrt.f32 %v1661_v54  ;;  %v1660_v55 = vmul.f32 0.03125, %v1658_v56 }
0x10bc   :  { %v1662_v60 = vadd.f32 1e-05, %v1660_v55 }
0x10be   :  { %2607 = vrsqrt.f32 %v1662_v60 }
0x10c4   :  { %v2606_v61 = vpop.eup %2605 }
0x10c5   :  { %v1665_v59 = vmul.f32 %v2606_v61, %v1649_v24 }
0x10c7   :  { %v1673_v20 = vmul.f32 %v2088_v62, %v1665_v59 }
0x10c8   :  { %v2608_v21 = vpop.eup %2607 }
0x10c9   :  { %v1666_v26 = vmul.f32 %v2608_v21, %v1650_v29  ;;  %v1681_v1 = vadd.f32 %v2089_v63, %v1673_v20  ;;  %v2647_v29 = vmov 0.0|0.0  }
0x10ca   :  { %2504 = vmatprep.subr.bf16.mxu0 %v2647_v29 }
0x10cb   :  { %v1674_v2 = vmul.f32 %v2088_v62, %v1666_v26  ;;  %2371 = vmatprep.mubr.msk.f32.mxu0 %vm189_vm1, %v1681_v1 }
0x10cd   :  { %v1682_v33 = vadd.f32 %v2089_v63, %v1674_v2 }
0x10cf   :  { %2372 = vmatmul.mubr.msk.f32.vlgmr.msra.gmra.mrb[22].mxu0 %vm189_vm1, %v1682_v33 }
0x10d0   :  { %2397 = vmatprep.mubr.msk.f32.mxu0 %vm2648_vm4, %v2649_v0 }
0x11a2   :  { %v2373_v40 = vpop.f32.mrb[22].mxu0 }
0x11a3   :  { %v1774_v4 = vadd.f32 %v2373_v40, %v2095_v3  ;;  %v1768_v5 = vpop.f32.mrb[23].mxu0 }
0x11a4   :  { %v1769_v6 = vadd.f32 %v2095_v3, %v1768_v5 }
0x11a5   :  { %v1778_v8 = vmax.f32 %v1774_v4, 0.0 }
0x11a6   :  { %v1777_v43 = vmax.f32 %v1769_v6, 0.0 }
0x11a8   :  { %2390 = vmatprep.mubr.msk.f32.mxu1 %vm919_vm3, %v1777_v43 }
0x11a9   :  { %2391 = vmatmul.mubr.msk.f32.vlgmr.msra.gmra.mrb[24].mxu1 %vm919_vm3, %v1778_v8 }
0x127c   :  { %v2392_v9 = vpop.f32.mrb[24].mxu1 }
0x127d   :  { %v1868_v10 = vpop.f32.mrb[25].mxu1  ;;  %v1874_v47 = vadd.f32 %v2392_v9, %v2107_v44 }
0x127e   :  { %v1869_v11 = vadd.f32 %v2107_v44, %v1868_v10 }
0x127f   :  { %v1878_v15 = vadd.f32 %v1874_v47, %v1682_v33 }
0x1280   :  { %v1877_v12 = vadd.f32 %v1869_v11, %v1681_v1 }
0x1281   :  { %v1886_v50 = vsel %vm189_vm1, %v1878_v15, 0.0 }
0x1282   :  { %v1883_v14 = vsel %vm189_vm1, %v1877_v12, 0.0 }
0x1283   :  { %1884 = vadd.xlane.f32.xlu1 %v1883_v14 }
0x1287   :  { %1887 = vadd.xlane.f32.xlu1 %v1886_v50 }
0x1310   :  { %v1885_v53 = vpop.xlane.xlu1 %1884 }
0x1311   :  { %v1889_v16 = vmul.f32 0.03125, %v1885_v53 }
0x1313   :  { %v1891_v18 = vsub.f32 %v1877_v12, %v1889_v16 }
0x1314   :  { %v1888_v19 = vpop.xlane.xlu1 %1887 }
0x1315   :  { %v1890_v22 = vmul.f32 0.03125, %v1888_v19  ;;  %v1893_v57 = vmul.f32 %v1891_v18, %v1891_v18 }
0x1317   :  { %v1892_v24 = vsub.f32 %v1878_v15, %v1890_v22  ;;  %v1895_v25 = vsel %vm189_vm1, %v1893_v57, 0.0 }
0x1318   :  { %1896 = vadd.xlane.f32.xlu0 %v1895_v25 }
0x1319   :  { %v1894_v58 = vmul.f32 %v1892_v24, %v1892_v24 }
0x131b   :  { %v1898_v27 = vsel %vm189_vm1, %v1894_v58, 0.0 }
0x131c   :  { %1899 = vadd.xlane.f32.xlu1 %v1898_v27 }
0x13a5   :  { %v1897_v30 = vpop.xlane.xlu0 %1896 }
0x13a6   :  { %v1901_v46 = vmul.f32 0.03125, %v1897_v30 }
0x13a8   :  { %v1903_v49 = vadd.f32 1e-05, %v1901_v46 }
0x13a9   :  { %v1900_v31 = vpop.xlane.xlu1 %1899 }
0x13aa   :  { %2609 = vrsqrt.f32 %v1903_v49  ;;  %v1902_v7 = vmul.f32 0.03125, %v1900_v31 }
0x13ac   :  { %v1904_v32 = vadd.f32 1e-05, %v1902_v7 }
0x13ae   :  { %2611 = vrsqrt.f32 %v1904_v32 }
0x13b4   :  { %v2610_v34 = vpop.eup %2609 }
0x13b5   :  { %v1907_v37 = vmul.f32 %v2610_v34, %v1891_v18 }
0x13b7   :  { %v1915_v28 = vmul.f32 %v2112_v38, %v1907_v37 }
0x13b8   :  { %v2612_v13 = vpop.eup %2611 }
0x13b9   :  { %v1908_v41 = vmul.f32 %v2612_v13, %v1892_v24  ;;  %v1923_v45 = vadd.f32 %v2113_v42, %v1915_v28 }
0x13bb   :  { %v1916_v17 = vmul.f32 %v2112_v38, %v1908_v41 }
0x13bd   :  { %v1924_v48 = vadd.f32 %v2113_v42, %v1916_v17 }
0x13bf   :  { %v2505_v51 = vpack.c.bf16 %v1924_v48, %v1923_v45 }
0x13c1   :  { %2506 = vmatpush3.bf16.msra.mxu0 %v2505_v51 }
0x13c4   :  { %2398 = vmatmul.mubr.msk.f32.vlgmr.msra.gmra.mrb[24].mxu0 %vm74_vm0, %v1925_v23 }
0x1497   :  { %v1995_v52 = vpop.f32.mrb[24].mxu0 }
0x1498   :  { %2000 = vst.msk [vmem:[#allocation2] sm:$0x3] %vm1999_vm5, %v1995_v52  ;;  %v2399_v54 = vpop.f32.mrb[25].mxu0 }
0x1499   :  { %2632 = shalt.err (!%p2629_p4)
}
0x149a   :  { %s2633_s7 = scalar_lea.hbm %s3263_s19, 32 }
0x149b   :  { %p2634_p5 = scmp.ne.s32.totalorder %s3263_s19, %s2633_s7  ;;  %p2637_p6 = scmp.lt.u32.totalorder %s2633_s7, %s3263_s19 }
0x149d   :  { %p2639_p7 = pnand %p2637_p6, %p2634_p5 }
0x149f   :  { %2642 = shalt.err (!%p2639_p7)
}
0x14a0   :  { %2010 = dma.vmem_to_hbm [thread:$0]  %s2008_s17, 32, %s3263_s19, [#allocation3]  }
0x14a1   :  { %2643 = dma.done.wait [#allocation3], 32  }
0x14a2   :  { %2644 = vsyncadd [#allocation3], 4294967264 }
0x14a3   :  { %2014 = vsyncpa [#allocation3], 1 }

</bundles_post_ra>
